<compile_context>
chip_gen: v5e
topology: v5e:2x2
jax: 0.10.0
libtpu: 0.0.40
codegen_flags: <defaults>
</compile_context>

<pallas_src>
import functools

import numpy as np
import jax
import jax.numpy as jnp
from jax.experimental import pallas as pl
from jax.experimental.pallas import tpu as pltpu


_DEFAULT_MSSSIM_WEIGHTS = (0.0448, 0.2856, 0.3001, 0.2363, 0.1333)


# ----------------------------------------------------------------------------
# Host-side constant construction (mirrors gaussian() / create_window())
# ----------------------------------------------------------------------------
def _gaussian_1d(window_size: int, sigma: float) -> np.ndarray:
    xs = np.arange(window_size, dtype=np.float64)
    g = np.exp(-((xs - window_size // 2) ** 2) / (2.0 * sigma ** 2))
    return (g / g.sum()).astype(np.float32)


def _band_rows(g: np.ndarray, n: int) -> np.ndarray:
    """B (n-ws+1, n) with B[i, i+d]=g[d]:  B @ X == 'valid' correlation along rows."""
    ws = g.shape[0]
    no = n - ws + 1
    b = np.zeros((no, n), np.float32)
    for d in range(ws):
        b[np.arange(no), np.arange(no) + d] = g[d]
    return b


def _pool_rows(n: int) -> np.ndarray:
    """P (n//2, n): P @ X == 2-mean pooling (stride 2) of X's rows (== avg_pool2d)."""
    no = n // 2
    p = np.zeros((no, n), np.float32)
    p[np.arange(no), 2 * np.arange(no)] = 0.5
    p[np.arange(no), 2 * np.arange(no) + 1] = 0.5
    return p


def _build_plan(H: int, W: int, window_size: int, sigma: float, levels: int):
    """Per-level shapes, blur constants (minimal, no kron) and pool constants."""
    plan = []          # dicts: h, w, ws, ho, wo, mode ('sep' | 'full')
    blur_consts = []   # flat: per level ('sep' -> gh, gw) or ('full' -> 2-D window)
    pool_consts = []   # flat: per transition ph (h//2,h), pw (w,w//2)
    h, w = H, W
    for lvl in range(levels):
        ws = min(window_size, h, w)     # matches: real_size = min(window_size, H, W)
        ho, wo = h - ws + 1, w - ws + 1
        g = _gaussian_1d(ws, sigma)
        if ho == 1 and wo == 1:
            # Window covers the whole image -> blur is a single weighted sum.
            mode = "full"
            blur_consts.append(np.outer(g, g).astype(np.float32))      # (h, w)
        else:
            # TODO(synk): mixed case (exactly one of ho/wo == 1) still uses a
            # size-1 matmul dim; not reachable for square inputs.
            mode = "sep"
            blur_consts.append(_band_rows(g, h))                        # (ho, h)
            blur_consts.append(_band_rows(g, w).T)                      # (w, wo)
        plan.append(dict(h=h, w=w, ws=ws, ho=ho, wo=wo, mode=mode))
        if lvl < levels - 1:
            if h < 2 or w < 2:
                raise ValueError("image too small for the requested number of MS-SSIM levels")
            pool_consts.append(_pool_rows(h))                           # (h//2, h)
            pool_consts.append(_pool_rows(w).T)                         # (w, w//2)
            h, w = h // 2, w // 2
    return plan, blur_consts, pool_consts


# ----------------------------------------------------------------------------
# Fused MS-SSIM pyramid kernel (one grid step == one (b, c) image pair)
# ----------------------------------------------------------------------------
def _make_msssim_kernel(plan, c1: float, c2: float, levels: int, n_blur: int):
    def kernel(*refs):
        idx = 0
        img1_ref = refs[idx]; idx += 1
        img2_ref = refs[idx]; idx += 1
        blur_refs = refs[idx:idx + n_blur]; idx += n_blur
        pool_refs = refs[idx:idx + 2 * (levels - 1)]; idx += 2 * (levels - 1)
        out_ref = refs[idx]

        x1 = img1_ref[0]                                   # (H, W) f32
        x2 = img2_ref[0]

        lane = jax.lax.broadcasted_iota(jnp.int32, (1, levels + 1), 1)
        acc = jnp.zeros((1, levels + 1), jnp.float32)      # [ssim_sum per lvl, cs_sum]

        bi = 0
        for lvl in range(levels):
            info = plan[lvl]
            h, w, ho, wo = info["h"], info["w"], info["ho"], info["wo"]

            if info["mode"] == "full":
                # ws == h == w: the blur output is a single weighted sum (VPU + reduce).
                w2d = blur_refs[bi][...]; bi += 1          # (h, w)
                mu1 = jnp.sum(x1 * w2d)
                mu2 = jnp.sum(x2 * w2d)
                e11 = jnp.sum(x1 * x1 * w2d)
                e22 = jnp.sum(x2 * x2 * w2d)
                e12 = jnp.sum(x1 * x2 * w2d)
            else:
                gh = blur_refs[bi][...]                    # (ho, h)
                gw = blur_refs[bi + 1][...]                # (w, wo)
                bi += 2
                # Stack the 5 quantities along sublanes and blur along W with ONE
                # shared matmul, then finish with 5 small row-filter matmuls.
                s = jnp.concatenate([x1, x2, x1 * x1, x2 * x2, x1 * x2], axis=0)  # (5h, w)
                cb = jnp.dot(s, gw, preferred_element_type=jnp.float32)           # (5h, wo)
                mu1 = jnp.dot(gh, cb[0 * h:1 * h, :], preferred_element_type=jnp.float32)
                mu2 = jnp.dot(gh, cb[1 * h:2 * h, :], preferred_element_type=jnp.float32)
                e11 = jnp.dot(gh, cb[2 * h:3 * h, :], preferred_element_type=jnp.float32)
                e22 = jnp.dot(gh, cb[3 * h:4 * h, :], preferred_element_type=jnp.float32)
                e12 = jnp.dot(gh, cb[4 * h:5 * h, :], preferred_element_type=jnp.float32)

            mu1_sq = mu1 * mu1
            mu2_sq = mu2 * mu2
            mu1_mu2 = mu1 * mu2
            sigma1_sq = e11 - mu1_sq
            sigma2_sq = e22 - mu2_sq
            sigma12 = e12 - mu1_mu2

            v1 = 2.0 * sigma12 + c2
            v2 = sigma1_sq + sigma2_sq + c2
            cs_map = v1 / v2
            ssim_map = cs_map * (2.0 * mu1_mu2 + c1) / (mu1_sq + mu2_sq + c1)

            acc = acc + jnp.where(lane == lvl, jnp.sum(ssim_map), 0.0)
            if lvl == levels - 1:
                # Reference msssim() only consumes cs from the last level.
                acc = acc + jnp.where(lane == levels, jnp.sum(cs_map), 0.0)
            else:
                # 2x2 average pooling (== F.avg_pool2d(x, (2, 2)) for even dims).
                ph = pool_refs[2 * lvl][...]               # (h//2, h)
                pw = pool_refs[2 * lvl + 1][...]           # (w, w//2)
                t1 = jnp.dot(x1, pw, preferred_element_type=jnp.float32)
                t2 = jnp.dot(x2, pw, preferred_element_type=jnp.float32)
                x1 = jnp.dot(ph, t1, preferred_element_type=jnp.float32)
                x2 = jnp.dot(ph, t2, preferred_element_type=jnp.float32)

        out_ref[0] = acc                                   # (1, levels+1)

    return kernel


# ----------------------------------------------------------------------------
# Wrapper: mirrors msssim() + MSSSIMLoss.forward
# ----------------------------------------------------------------------------
def msssim_loss(img1, img2, *, img_range: float, window_size: int = 11,
                sigma: float = 1.5, weights=_DEFAULT_MSSSIM_WEIGHTS):
    levels = int(len(weights))
    weights = jnp.asarray(weights, jnp.float32)

    B, C, H, W = img1.shape
    bc = B * C

    plan, blur_consts, pool_consts = _build_plan(H, W, window_size, sigma, levels)
    c1 = float((0.01 * img_range) ** 2)
    c2 = float((0.03 * img_range) ** 2)

    # Free reshape (B, C contiguous leading dims) -> one image pair per grid step.
    x1 = img1.astype(jnp.float32).reshape(bc, H, W)
    x2 = img2.astype(jnp.float32).reshape(bc, H, W)

    const_arrays = [jnp.asarray(a) for a in (blur_consts + pool_consts)]
    n_blur = len(blur_consts)

    in_specs = [pl.BlockSpec((1, H, W), lambda i: (i, 0, 0)),
                pl.BlockSpec((1, H, W), lambda i: (i, 0, 0))]
    in_specs += [pl.BlockSpec(a.shape, lambda i: (0, 0)) for a in const_arrays]

    out_shape = jax.ShapeDtypeStruct((bc, 1, levels + 1), jnp.float32)
    out_specs = pl.BlockSpec((1, 1, levels + 1), lambda i: (i, 0, 0))

    # Rough cost estimate so XLA schedules around the custom call sensibly.
    flops = 0
    bytes_accessed = 4 * (2 * bc * H * W + bc * (levels + 1))
    for a in const_arrays:
        bytes_accessed += 4 * int(np.prod(a.shape))
    for lvl, info in enumerate(plan):
        h, w, ho, wo = info["h"], info["w"], info["ho"], info["wo"]
        if info["mode"] == "sep":
            flops += 2 * 5 * h * w * wo + 5 * 2 * ho * h * wo + 3 * h * w + 14 * ho * wo
        else:
            flops += 10 * h * w + 20
        if lvl < levels - 1:
            flops += 2 * (2 * h * w * (w // 2) + 2 * (h // 2) * h * (w // 2))
    flops *= bc

    kernel = _make_msssim_kernel(plan, c1, c2, levels, n_blur)

    part_sums = pl.pallas_call(
        kernel,
        out_shape=out_shape,
        grid=(bc,),
        in_specs=in_specs,
        out_specs=out_specs,
        compiler_params=pltpu.CompilerParams(dimension_semantics=("parallel",)),
        cost_estimate=pl.CostEstimate(flops=int(flops), transcendentals=0,
                                      bytes_accessed=int(bytes_accessed)),
    )(x1, x2, *const_arrays)

    # Combine per-image-pair partial sums into global means (== .mean() over B,C,ho,wo).
    sums = jnp.sum(part_sums[:, 0, :], axis=0)                       # (levels+1,)
    counts = np.asarray([bc * p["ho"] * p["wo"] for p in plan]
                        + [bc * plan[-1]["ho"] * plan[-1]["wo"]], np.float32)
    means = sums / jnp.asarray(counts)
    ssims = means[:levels]
    cs_last = means[levels]

    # Exactly the reference combination: mcs**w[-1] * prod(ssims**w).
    # (Negative ssim/cs with fractional powers NaNs just like the PyTorch reference.)
    ms = cs_last ** weights[-1] * jnp.prod(ssims ** weights)
    return (1.0 - ms).astype(jnp.float32)


class MSSSIMLoss:
    """JAX/Pallas equivalent of the PyTorch MSSSIMLoss module (forward pass)."""

    def __init__(self, img_range: float, window_size: int = 11):
        self.img_range = img_range
        self.window_size = window_size
        self._fn = jax.jit(functools.partial(
            msssim_loss, img_range=img_range, window_size=window_size))

    def __call__(self, img1, img2):
        return self._fn(img1, img2)


if __name__ == "__main__":
    # 32x32 spatial so that all 5 MS-SSIM pyramid levels (down to 2x2) are valid,
    # as the reference PyTorch module requires.
    B, C, H, W = 2, 3, 32, 32
    img_range = 1.0

    key = jax.random.PRNGKey(0)
    k1, k2 = jax.random.split(key)
    img1 = jax.random.uniform(k1, (B, C, H, W), dtype=jnp.float32)
    img2 = jnp.clip(img1 + 0.05 * jax.random.normal(k2, (B, C, H, W), dtype=jnp.float32),
                    0.0, 1.0)

    loss_fn = MSSSIMLoss(img_range=img_range, window_size=11)
    loss = loss_fn(img1, img2)
    jax.block_until_ready(loss)
    print("KERNEL_OK")
</pallas_src>

<mosaic_0001>
module attributes {stable_mosaic.version = 11 : i64} {
  func.func @kernel(%arg0: i32, %arg1: memref<1x32x32xf32, #tpu.memory_space<vmem>>, %arg2: memref<1x32x32xf32, #tpu.memory_space<vmem>>, %arg3: memref<22x32xf32, #tpu.memory_space<vmem>>, %arg4: memref<32x22xf32, #tpu.memory_space<vmem>>, %arg5: memref<6x16xf32, #tpu.memory_space<vmem>>, %arg6: memref<16x6xf32, #tpu.memory_space<vmem>>, %arg7: memref<8x8xf32, #tpu.memory_space<vmem>>, %arg8: memref<4x4xf32, #tpu.memory_space<vmem>>, %arg9: memref<2x2xf32, #tpu.memory_space<vmem>>, %arg10: memref<16x32xf32, #tpu.memory_space<vmem>>, %arg11: memref<32x16xf32, #tpu.memory_space<vmem>>, %arg12: memref<8x16xf32, #tpu.memory_space<vmem>>, %arg13: memref<16x8xf32, #tpu.memory_space<vmem>>, %arg14: memref<4x8xf32, #tpu.memory_space<vmem>>, %arg15: memref<8x4xf32, #tpu.memory_space<vmem>>, %arg16: memref<2x4xf32, #tpu.memory_space<vmem>>, %arg17: memref<4x2xf32, #tpu.memory_space<vmem>>, %arg18: memref<1x1x6xf32, #tpu.memory_space<vmem>>) attributes {dimension_semantics = [#tpu.dimension_semantics<parallel>], iteration_bounds = array<i64: 6>, scalar_prefetch = 0 : i64, scratch_operands = 0 : i64, tpu.core_type = #tpu.core_type<tc>, window_params = [{transform_indices = @transform_0, window_bounds = array<i64: 1, 32, 32>}, {transform_indices = @transform_1, window_bounds = array<i64: 1, 32, 32>}, {pipeline_mode = #tpu.pipeline_mode<synchronous>, transform_indices = @transform_2, window_bounds = array<i64: 22, 32>}, {pipeline_mode = #tpu.pipeline_mode<synchronous>, transform_indices = @transform_3, window_bounds = array<i64: 32, 22>}, {pipeline_mode = #tpu.pipeline_mode<synchronous>, transform_indices = @transform_4, window_bounds = array<i64: 6, 16>}, {pipeline_mode = #tpu.pipeline_mode<synchronous>, transform_indices = @transform_5, window_bounds = array<i64: 16, 6>}, {pipeline_mode = #tpu.pipeline_mode<synchronous>, transform_indices = @transform_6, window_bounds = array<i64: 8, 8>}, {pipeline_mode = #tpu.pipeline_mode<synchronous>, transform_indices = @transform_7, window_bounds = array<i64: 4, 4>}, {pipeline_mode = #tpu.pipeline_mode<synchronous>, transform_indices = @transform_8, window_bounds = array<i64: 2, 2>}, {pipeline_mode = #tpu.pipeline_mode<synchronous>, transform_indices = @transform_9, window_bounds = array<i64: 16, 32>}, {pipeline_mode = #tpu.pipeline_mode<synchronous>, transform_indices = @transform_10, window_bounds = array<i64: 32, 16>}, {pipeline_mode = #tpu.pipeline_mode<synchronous>, transform_indices = @transform_11, window_bounds = array<i64: 8, 16>}, {pipeline_mode = #tpu.pipeline_mode<synchronous>, transform_indices = @transform_12, window_bounds = array<i64: 16, 8>}, {pipeline_mode = #tpu.pipeline_mode<synchronous>, transform_indices = @transform_13, window_bounds = array<i64: 4, 8>}, {pipeline_mode = #tpu.pipeline_mode<synchronous>, transform_indices = @transform_14, window_bounds = array<i64: 8, 4>}, {pipeline_mode = #tpu.pipeline_mode<synchronous>, transform_indices = @transform_15, window_bounds = array<i64: 2, 4>}, {pipeline_mode = #tpu.pipeline_mode<synchronous>, transform_indices = @transform_16, window_bounds = array<i64: 4, 2>}, {transform_indices = @transform_17, window_bounds = array<i64: 1, 1, 6>}]} {
    %c0 = arith.constant 0 : index
    %c0_0 = arith.constant 0 : index
    %c0_1 = arith.constant 0 : index
    %0 = vector.load %arg1[%c0, %c0_0, %c0_1] : memref<1x32x32xf32, #tpu.memory_space<vmem>>, vector<1x32x32xf32>
    %1 = vector.shape_cast %0 : vector<1x32x32xf32> to vector<32x32xf32>
    %c0_2 = arith.constant 0 : index
    %c0_3 = arith.constant 0 : index
    %c0_4 = arith.constant 0 : index
    %2 = vector.load %arg2[%c0_2, %c0_3, %c0_4] : memref<1x32x32xf32, #tpu.memory_space<vmem>>, vector<1x32x32xf32>
    %3 = vector.shape_cast %2 : vector<1x32x32xf32> to vector<32x32xf32>
    %4 = tpu.iota {dimensions = array<i32: 1>} : vector<1x6xi32>
    %cst = arith.constant 0.000000e+00 : f32
    %5 = vector.broadcast %cst : f32 to vector<1x6xf32>
    %c0_5 = arith.constant 0 : index
    %c0_6 = arith.constant 0 : index
    %6 = vector.load %arg3[%c0_5, %c0_6] : memref<22x32xf32, #tpu.memory_space<vmem>>, vector<22x32xf32>
    %c0_7 = arith.constant 0 : index
    %c0_8 = arith.constant 0 : index
    %7 = vector.load %arg4[%c0_7, %c0_8] : memref<32x22xf32, #tpu.memory_space<vmem>>, vector<32x22xf32>
    %8 = arith.mulf %1, %1 : vector<32x32xf32>
    %9 = arith.mulf %3, %3 : vector<32x32xf32>
    %10 = arith.mulf %1, %3 : vector<32x32xf32>
    %11 = tpu.concatenate %1, %3, %8, %9, %10 in 0 : vector<32x32xf32>, vector<32x32xf32>, vector<32x32xf32>, vector<32x32xf32>, vector<32x32xf32> -> vector<160x32xf32>
    %cst_9 = arith.constant dense<0.000000e+00> : vector<160x22xf32>
    %12 = tpu.matmul %11, %7, %cst_9 {dimension_numbers = #tpu.dot_dimension_numbers<[1], [0], [0], [1], [0, 0, 1, 1], [], []>} : vector<160x32xf32>, vector<32x22xf32>, vector<160x22xf32> -> vector<160x22xf32>
    %13 = vector.extract_strided_slice %12 {offsets = [0, 0], sizes = [32, 22], strides = [1, 1]} : vector<160x22xf32> to vector<32x22xf32>
    %cst_10 = arith.constant dense<0.000000e+00> : vector<22x22xf32>
    %14 = tpu.matmul %6, %13, %cst_10 {dimension_numbers = #tpu.dot_dimension_numbers<[1], [0], [0], [1], [0, 0, 1, 1], [], []>} : vector<22x32xf32>, vector<32x22xf32>, vector<22x22xf32> -> vector<22x22xf32>
    %15 = vector.extract_strided_slice %12 {offsets = [32, 0], sizes = [32, 22], strides = [1, 1]} : vector<160x22xf32> to vector<32x22xf32>
    %cst_11 = arith.constant dense<0.000000e+00> : vector<22x22xf32>
    %16 = tpu.matmul %6, %15, %cst_11 {dimension_numbers = #tpu.dot_dimension_numbers<[1], [0], [0], [1], [0, 0, 1, 1], [], []>} : vector<22x32xf32>, vector<32x22xf32>, vector<22x22xf32> -> vector<22x22xf32>
    %17 = vector.extract_strided_slice %12 {offsets = [64, 0], sizes = [32, 22], strides = [1, 1]} : vector<160x22xf32> to vector<32x22xf32>
    %cst_12 = arith.constant dense<0.000000e+00> : vector<22x22xf32>
    %18 = tpu.matmul %6, %17, %cst_12 {dimension_numbers = #tpu.dot_dimension_numbers<[1], [0], [0], [1], [0, 0, 1, 1], [], []>} : vector<22x32xf32>, vector<32x22xf32>, vector<22x22xf32> -> vector<22x22xf32>
    %19 = vector.extract_strided_slice %12 {offsets = [96, 0], sizes = [32, 22], strides = [1, 1]} : vector<160x22xf32> to vector<32x22xf32>
    %cst_13 = arith.constant dense<0.000000e+00> : vector<22x22xf32>
    %20 = tpu.matmul %6, %19, %cst_13 {dimension_numbers = #tpu.dot_dimension_numbers<[1], [0], [0], [1], [0, 0, 1, 1], [], []>} : vector<22x32xf32>, vector<32x22xf32>, vector<22x22xf32> -> vector<22x22xf32>
    %21 = vector.extract_strided_slice %12 {offsets = [128, 0], sizes = [32, 22], strides = [1, 1]} : vector<160x22xf32> to vector<32x22xf32>
    %cst_14 = arith.constant dense<0.000000e+00> : vector<22x22xf32>
    %22 = tpu.matmul %6, %21, %cst_14 {dimension_numbers = #tpu.dot_dimension_numbers<[1], [0], [0], [1], [0, 0, 1, 1], [], []>} : vector<22x32xf32>, vector<32x22xf32>, vector<22x22xf32> -> vector<22x22xf32>
    %23 = arith.mulf %14, %14 : vector<22x22xf32>
    %24 = arith.mulf %16, %16 : vector<22x22xf32>
    %25 = arith.mulf %14, %16 : vector<22x22xf32>
    %26 = arith.subf %18, %23 : vector<22x22xf32>
    %27 = arith.subf %20, %24 : vector<22x22xf32>
    %28 = arith.subf %22, %25 : vector<22x22xf32>
    %cst_15 = arith.constant 2.000000e+00 : f32
    %29 = vector.broadcast %cst_15 : f32 to vector<22x22xf32>
    %30 = arith.mulf %29, %28 : vector<22x22xf32>
    %cst_16 = arith.constant 8.99999984E-4 : f32
    %31 = vector.broadcast %cst_16 : f32 to vector<22x22xf32>
    %32 = arith.addf %30, %31 : vector<22x22xf32>
    %33 = arith.addf %26, %27 : vector<22x22xf32>
    %cst_17 = arith.constant 8.99999984E-4 : f32
    %34 = vector.broadcast %cst_17 : f32 to vector<22x22xf32>
    %35 = arith.addf %33, %34 : vector<22x22xf32>
    %36 = arith.divf %32, %35 : vector<22x22xf32>
    %cst_18 = arith.constant 2.000000e+00 : f32
    %37 = vector.broadcast %cst_18 : f32 to vector<22x22xf32>
    %38 = arith.mulf %37, %25 : vector<22x22xf32>
    %cst_19 = arith.constant 9.99999974E-5 : f32
    %39 = vector.broadcast %cst_19 : f32 to vector<22x22xf32>
    %40 = arith.addf %38, %39 : vector<22x22xf32>
    %41 = arith.mulf %36, %40 : vector<22x22xf32>
    %42 = arith.addf %23, %24 : vector<22x22xf32>
    %cst_20 = arith.constant 9.99999974E-5 : f32
    %43 = vector.broadcast %cst_20 : f32 to vector<22x22xf32>
    %44 = arith.addf %42, %43 : vector<22x22xf32>
    %45 = arith.divf %41, %44 : vector<22x22xf32>
    %c0_i32 = arith.constant 0 : i32
    %46 = vector.broadcast %c0_i32 : i32 to vector<1x6xi32>
    %47 = arith.cmpi eq, %4, %46 : vector<1x6xi32>
    %48 = vector.shape_cast %45 : vector<22x22xf32> to vector<1x22x22xf32>
    %cst_21 = arith.constant dense<0.000000e+00> : vector<1xf32>
    %49 = vector.multi_reduction <add>, %48, %cst_21 [1, 2] : vector<1x22x22xf32> to vector<1xf32>
    %50 = vector.shape_cast %49 : vector<1xf32> to vector<1x1x1xf32>
    %51 = vector.extract %50[0, 0, 0] : f32 from vector<1x1x1xf32>
    %cst_22 = arith.constant 0.000000e+00 : f32
    %52 = vector.broadcast %51 : f32 to vector<1x6xf32>
    %53 = vector.broadcast %cst_22 : f32 to vector<1x6xf32>
    %54 = arith.select %47, %52, %53 : vector<1x6xi1>, vector<1x6xf32>
    %55 = arith.addf %5, %54 : vector<1x6xf32>
    %c0_23 = arith.constant 0 : index
    %c0_24 = arith.constant 0 : index
    %56 = vector.load %arg10[%c0_23, %c0_24] : memref<16x32xf32, #tpu.memory_space<vmem>>, vector<16x32xf32>
    %c0_25 = arith.constant 0 : index
    %c0_26 = arith.constant 0 : index
    %57 = vector.load %arg11[%c0_25, %c0_26] : memref<32x16xf32, #tpu.memory_space<vmem>>, vector<32x16xf32>
    %cst_27 = arith.constant dense<0.000000e+00> : vector<32x16xf32>
    %58 = tpu.matmul %1, %57, %cst_27 {dimension_numbers = #tpu.dot_dimension_numbers<[1], [0], [0], [1], [0, 0, 1, 1], [], []>} : vector<32x32xf32>, vector<32x16xf32>, vector<32x16xf32> -> vector<32x16xf32>
    %cst_28 = arith.constant dense<0.000000e+00> : vector<32x16xf32>
    %59 = tpu.matmul %3, %57, %cst_28 {dimension_numbers = #tpu.dot_dimension_numbers<[1], [0], [0], [1], [0, 0, 1, 1], [], []>} : vector<32x32xf32>, vector<32x16xf32>, vector<32x16xf32> -> vector<32x16xf32>
    %cst_29 = arith.constant dense<0.000000e+00> : vector<16x16xf32>
    %60 = tpu.matmul %56, %58, %cst_29 {dimension_numbers = #tpu.dot_dimension_numbers<[1], [0], [0], [1], [0, 0, 1, 1], [], []>} : vector<16x32xf32>, vector<32x16xf32>, vector<16x16xf32> -> vector<16x16xf32>
    %cst_30 = arith.constant dense<0.000000e+00> : vector<16x16xf32>
    %61 = tpu.matmul %56, %59, %cst_30 {dimension_numbers = #tpu.dot_dimension_numbers<[1], [0], [0], [1], [0, 0, 1, 1], [], []>} : vector<16x32xf32>, vector<32x16xf32>, vector<16x16xf32> -> vector<16x16xf32>
    %c0_31 = arith.constant 0 : index
    %c0_32 = arith.constant 0 : index
    %62 = vector.load %arg5[%c0_31, %c0_32] : memref<6x16xf32, #tpu.memory_space<vmem>>, vector<6x16xf32>
    %c0_33 = arith.constant 0 : index
    %c0_34 = arith.constant 0 : index
    %63 = vector.load %arg6[%c0_33, %c0_34] : memref<16x6xf32, #tpu.memory_space<vmem>>, vector<16x6xf32>
    %64 = arith.mulf %60, %60 : vector<16x16xf32>
    %65 = arith.mulf %61, %61 : vector<16x16xf32>
    %66 = arith.mulf %60, %61 : vector<16x16xf32>
    %67 = tpu.concatenate %60, %61, %64, %65, %66 in 0 : vector<16x16xf32>, vector<16x16xf32>, vector<16x16xf32>, vector<16x16xf32>, vector<16x16xf32> -> vector<80x16xf32>
    %cst_35 = arith.constant dense<0.000000e+00> : vector<80x6xf32>
    %68 = tpu.matmul %67, %63, %cst_35 {dimension_numbers = #tpu.dot_dimension_numbers<[1], [0], [0], [1], [0, 0, 1, 1], [], []>} : vector<80x16xf32>, vector<16x6xf32>, vector<80x6xf32> -> vector<80x6xf32>
    %69 = vector.extract_strided_slice %68 {offsets = [0, 0], sizes = [16, 6], strides = [1, 1]} : vector<80x6xf32> to vector<16x6xf32>
    %cst_36 = arith.constant dense<0.000000e+00> : vector<6x6xf32>
    %70 = tpu.matmul %62, %69, %cst_36 {dimension_numbers = #tpu.dot_dimension_numbers<[1], [0], [0], [1], [0, 0, 1, 1], [], []>} : vector<6x16xf32>, vector<16x6xf32>, vector<6x6xf32> -> vector<6x6xf32>
    %71 = vector.extract_strided_slice %68 {offsets = [16, 0], sizes = [16, 6], strides = [1, 1]} : vector<80x6xf32> to vector<16x6xf32>
    %cst_37 = arith.constant dense<0.000000e+00> : vector<6x6xf32>
    %72 = tpu.matmul %62, %71, %cst_37 {dimension_numbers = #tpu.dot_dimension_numbers<[1], [0], [0], [1], [0, 0, 1, 1], [], []>} : vector<6x16xf32>, vector<16x6xf32>, vector<6x6xf32> -> vector<6x6xf32>
    %73 = vector.extract_strided_slice %68 {offsets = [32, 0], sizes = [16, 6], strides = [1, 1]} : vector<80x6xf32> to vector<16x6xf32>
    %cst_38 = arith.constant dense<0.000000e+00> : vector<6x6xf32>
    %74 = tpu.matmul %62, %73, %cst_38 {dimension_numbers = #tpu.dot_dimension_numbers<[1], [0], [0], [1], [0, 0, 1, 1], [], []>} : vector<6x16xf32>, vector<16x6xf32>, vector<6x6xf32> -> vector<6x6xf32>
    %75 = vector.extract_strided_slice %68 {offsets = [48, 0], sizes = [16, 6], strides = [1, 1]} : vector<80x6xf32> to vector<16x6xf32>
    %cst_39 = arith.constant dense<0.000000e+00> : vector<6x6xf32>
    %76 = tpu.matmul %62, %75, %cst_39 {dimension_numbers = #tpu.dot_dimension_numbers<[1], [0], [0], [1], [0, 0, 1, 1], [], []>} : vector<6x16xf32>, vector<16x6xf32>, vector<6x6xf32> -> vector<6x6xf32>
    %77 = vector.extract_strided_slice %68 {offsets = [64, 0], sizes = [16, 6], strides = [1, 1]} : vector<80x6xf32> to vector<16x6xf32>
    %cst_40 = arith.constant dense<0.000000e+00> : vector<6x6xf32>
    %78 = tpu.matmul %62, %77, %cst_40 {dimension_numbers = #tpu.dot_dimension_numbers<[1], [0], [0], [1], [0, 0, 1, 1], [], []>} : vector<6x16xf32>, vector<16x6xf32>, vector<6x6xf32> -> vector<6x6xf32>
    %79 = arith.mulf %70, %70 : vector<6x6xf32>
    %80 = arith.mulf %72, %72 : vector<6x6xf32>
    %81 = arith.mulf %70, %72 : vector<6x6xf32>
    %82 = arith.subf %74, %79 : vector<6x6xf32>
    %83 = arith.subf %76, %80 : vector<6x6xf32>
    %84 = arith.subf %78, %81 : vector<6x6xf32>
    %cst_41 = arith.constant 2.000000e+00 : f32
    %85 = vector.broadcast %cst_41 : f32 to vector<6x6xf32>
    %86 = arith.mulf %85, %84 : vector<6x6xf32>
    %cst_42 = arith.constant 8.99999984E-4 : f32
    %87 = vector.broadcast %cst_42 : f32 to vector<6x6xf32>
    %88 = arith.addf %86, %87 : vector<6x6xf32>
    %89 = arith.addf %82, %83 : vector<6x6xf32>
    %cst_43 = arith.constant 8.99999984E-4 : f32
    %90 = vector.broadcast %cst_43 : f32 to vector<6x6xf32>
    %91 = arith.addf %89, %90 : vector<6x6xf32>
    %92 = arith.divf %88, %91 : vector<6x6xf32>
    %cst_44 = arith.constant 2.000000e+00 : f32
    %93 = vector.broadcast %cst_44 : f32 to vector<6x6xf32>
    %94 = arith.mulf %93, %81 : vector<6x6xf32>
    %cst_45 = arith.constant 9.99999974E-5 : f32
    %95 = vector.broadcast %cst_45 : f32 to vector<6x6xf32>
    %96 = arith.addf %94, %95 : vector<6x6xf32>
    %97 = arith.mulf %92, %96 : vector<6x6xf32>
    %98 = arith.addf %79, %80 : vector<6x6xf32>
    %cst_46 = arith.constant 9.99999974E-5 : f32
    %99 = vector.broadcast %cst_46 : f32 to vector<6x6xf32>
    %100 = arith.addf %98, %99 : vector<6x6xf32>
    %101 = arith.divf %97, %100 : vector<6x6xf32>
    %c1_i32 = arith.constant 1 : i32
    %102 = vector.broadcast %c1_i32 : i32 to vector<1x6xi32>
    %103 = arith.cmpi eq, %4, %102 : vector<1x6xi32>
    %104 = vector.shape_cast %101 : vector<6x6xf32> to vector<1x6x6xf32>
    %cst_47 = arith.constant dense<0.000000e+00> : vector<1xf32>
    %105 = vector.multi_reduction <add>, %104, %cst_47 [1, 2] : vector<1x6x6xf32> to vector<1xf32>
    %106 = vector.shape_cast %105 : vector<1xf32> to vector<1x1x1xf32>
    %107 = vector.extract %106[0, 0, 0] : f32 from vector<1x1x1xf32>
    %cst_48 = arith.constant 0.000000e+00 : f32
    %108 = vector.broadcast %107 : f32 to vector<1x6xf32>
    %109 = vector.broadcast %cst_48 : f32 to vector<1x6xf32>
    %110 = arith.select %103, %108, %109 : vector<1x6xi1>, vector<1x6xf32>
    %111 = arith.addf %55, %110 : vector<1x6xf32>
    %c0_49 = arith.constant 0 : index
    %c0_50 = arith.constant 0 : index
    %112 = vector.load %arg12[%c0_49, %c0_50] : memref<8x16xf32, #tpu.memory_space<vmem>>, vector<8x16xf32>
    %c0_51 = arith.constant 0 : index
    %c0_52 = arith.constant 0 : index
    %113 = vector.load %arg13[%c0_51, %c0_52] : memref<16x8xf32, #tpu.memory_space<vmem>>, vector<16x8xf32>
    %cst_53 = arith.constant dense<0.000000e+00> : vector<16x8xf32>
    %114 = tpu.matmul %60, %113, %cst_53 {dimension_numbers = #tpu.dot_dimension_numbers<[1], [0], [0], [1], [0, 0, 1, 1], [], []>} : vector<16x16xf32>, vector<16x8xf32>, vector<16x8xf32> -> vector<16x8xf32>
    %cst_54 = arith.constant dense<0.000000e+00> : vector<16x8xf32>
    %115 = tpu.matmul %61, %113, %cst_54 {dimension_numbers = #tpu.dot_dimension_numbers<[1], [0], [0], [1], [0, 0, 1, 1], [], []>} : vector<16x16xf32>, vector<16x8xf32>, vector<16x8xf32> -> vector<16x8xf32>
    %cst_55 = arith.constant dense<0.000000e+00> : vector<8x8xf32>
    %116 = tpu.matmul %112, %114, %cst_55 {dimension_numbers = #tpu.dot_dimension_numbers<[1], [0], [0], [1], [0, 0, 1, 1], [], []>} : vector<8x16xf32>, vector<16x8xf32>, vector<8x8xf32> -> vector<8x8xf32>
    %cst_56 = arith.constant dense<0.000000e+00> : vector<8x8xf32>
    %117 = tpu.matmul %112, %115, %cst_56 {dimension_numbers = #tpu.dot_dimension_numbers<[1], [0], [0], [1], [0, 0, 1, 1], [], []>} : vector<8x16xf32>, vector<16x8xf32>, vector<8x8xf32> -> vector<8x8xf32>
    %c0_57 = arith.constant 0 : index
    %c0_58 = arith.constant 0 : index
    %118 = vector.load %arg7[%c0_57, %c0_58] : memref<8x8xf32, #tpu.memory_space<vmem>>, vector<8x8xf32>
    %119 = arith.mulf %116, %118 : vector<8x8xf32>
    %120 = vector.shape_cast %119 : vector<8x8xf32> to vector<1x8x8xf32>
    %cst_59 = arith.constant dense<0.000000e+00> : vector<1xf32>
    %121 = vector.multi_reduction <add>, %120, %cst_59 [1, 2] : vector<1x8x8xf32> to vector<1xf32>
    %122 = vector.shape_cast %121 : vector<1xf32> to vector<1x1x1xf32>
    %123 = vector.extract %122[0, 0, 0] : f32 from vector<1x1x1xf32>
    %124 = arith.mulf %117, %118 : vector<8x8xf32>
    %125 = vector.shape_cast %124 : vector<8x8xf32> to vector<1x8x8xf32>
    %cst_60 = arith.constant dense<0.000000e+00> : vector<1xf32>
    %126 = vector.multi_reduction <add>, %125, %cst_60 [1, 2] : vector<1x8x8xf32> to vector<1xf32>
    %127 = vector.shape_cast %126 : vector<1xf32> to vector<1x1x1xf32>
    %128 = vector.extract %127[0, 0, 0] : f32 from vector<1x1x1xf32>
    %129 = arith.mulf %116, %116 : vector<8x8xf32>
    %130 = arith.mulf %129, %118 : vector<8x8xf32>
    %131 = vector.shape_cast %130 : vector<8x8xf32> to vector<1x8x8xf32>
    %cst_61 = arith.constant dense<0.000000e+00> : vector<1xf32>
    %132 = vector.multi_reduction <add>, %131, %cst_61 [1, 2] : vector<1x8x8xf32> to vector<1xf32>
    %133 = vector.shape_cast %132 : vector<1xf32> to vector<1x1x1xf32>
    %134 = vector.extract %133[0, 0, 0] : f32 from vector<1x1x1xf32>
    %135 = arith.mulf %117, %117 : vector<8x8xf32>
    %136 = arith.mulf %135, %118 : vector<8x8xf32>
    %137 = vector.shape_cast %136 : vector<8x8xf32> to vector<1x8x8xf32>
    %cst_62 = arith.constant dense<0.000000e+00> : vector<1xf32>
    %138 = vector.multi_reduction <add>, %137, %cst_62 [1, 2] : vector<1x8x8xf32> to vector<1xf32>
    %139 = vector.shape_cast %138 : vector<1xf32> to vector<1x1x1xf32>
    %140 = vector.extract %139[0, 0, 0] : f32 from vector<1x1x1xf32>
    %141 = arith.mulf %116, %117 : vector<8x8xf32>
    %142 = arith.mulf %141, %118 : vector<8x8xf32>
    %143 = vector.shape_cast %142 : vector<8x8xf32> to vector<1x8x8xf32>
    %cst_63 = arith.constant dense<0.000000e+00> : vector<1xf32>
    %144 = vector.multi_reduction <add>, %143, %cst_63 [1, 2] : vector<1x8x8xf32> to vector<1xf32>
    %145 = vector.shape_cast %144 : vector<1xf32> to vector<1x1x1xf32>
    %146 = vector.extract %145[0, 0, 0] : f32 from vector<1x1x1xf32>
    %147 = arith.mulf %123, %123 : f32
    %148 = arith.mulf %128, %128 : f32
    %149 = arith.mulf %123, %128 : f32
    %150 = arith.subf %134, %147 : f32
    %151 = arith.subf %140, %148 : f32
    %152 = arith.subf %146, %149 : f32
    %cst_64 = arith.constant 2.000000e+00 : f32
    %153 = arith.mulf %cst_64, %152 : f32
    %cst_65 = arith.constant 8.99999984E-4 : f32
    %154 = arith.addf %153, %cst_65 : f32
    %155 = arith.addf %150, %151 : f32
    %cst_66 = arith.constant 8.99999984E-4 : f32
    %156 = arith.addf %155, %cst_66 : f32
    %157 = arith.divf %154, %156 : f32
    %cst_67 = arith.constant 2.000000e+00 : f32
    %158 = arith.mulf %cst_67, %149 : f32
    %cst_68 = arith.constant 9.99999974E-5 : f32
    %159 = arith.addf %158, %cst_68 : f32
    %160 = arith.mulf %157, %159 : f32
    %161 = arith.addf %147, %148 : f32
    %cst_69 = arith.constant 9.99999974E-5 : f32
    %162 = arith.addf %161, %cst_69 : f32
    %163 = arith.divf %160, %162 : f32
    %c2_i32 = arith.constant 2 : i32
    %164 = vector.broadcast %c2_i32 : i32 to vector<1x6xi32>
    %165 = arith.cmpi eq, %4, %164 : vector<1x6xi32>
    %166 = vector.broadcast %163 : f32 to vector<1xf32>
    %cst_70 = arith.constant dense<0.000000e+00> : vector<1xf32>
    %167 = vector.multi_reduction <add>, %166, %cst_70 [] : vector<1xf32> to vector<1xf32>
    %168 = vector.extract %167[0] : f32 from vector<1xf32>
    %cst_71 = arith.constant 0.000000e+00 : f32
    %169 = vector.broadcast %168 : f32 to vector<1x6xf32>
    %170 = vector.broadcast %cst_71 : f32 to vector<1x6xf32>
    %171 = arith.select %165, %169, %170 : vector<1x6xi1>, vector<1x6xf32>
    %172 = arith.addf %111, %171 : vector<1x6xf32>
    %c0_72 = arith.constant 0 : index
    %c0_73 = arith.constant 0 : index
    %173 = vector.load %arg14[%c0_72, %c0_73] : memref<4x8xf32, #tpu.memory_space<vmem>>, vector<4x8xf32>
    %c0_74 = arith.constant 0 : index
    %c0_75 = arith.constant 0 : index
    %174 = vector.load %arg15[%c0_74, %c0_75] : memref<8x4xf32, #tpu.memory_space<vmem>>, vector<8x4xf32>
    %cst_76 = arith.constant dense<0.000000e+00> : vector<8x4xf32>
    %175 = tpu.matmul %116, %174, %cst_76 {dimension_numbers = #tpu.dot_dimension_numbers<[1], [0], [0], [1], [0, 0, 1, 1], [], []>} : vector<8x8xf32>, vector<8x4xf32>, vector<8x4xf32> -> vector<8x4xf32>
    %cst_77 = arith.constant dense<0.000000e+00> : vector<8x4xf32>
    %176 = tpu.matmul %117, %174, %cst_77 {dimension_numbers = #tpu.dot_dimension_numbers<[1], [0], [0], [1], [0, 0, 1, 1], [], []>} : vector<8x8xf32>, vector<8x4xf32>, vector<8x4xf32> -> vector<8x4xf32>
    %cst_78 = arith.constant dense<0.000000e+00> : vector<4x4xf32>
    %177 = tpu.matmul %173, %175, %cst_78 {dimension_numbers = #tpu.dot_dimension_numbers<[1], [0], [0], [1], [0, 0, 1, 1], [], []>} : vector<4x8xf32>, vector<8x4xf32>, vector<4x4xf32> -> vector<4x4xf32>
    %cst_79 = arith.constant dense<0.000000e+00> : vector<4x4xf32>
    %178 = tpu.matmul %173, %176, %cst_79 {dimension_numbers = #tpu.dot_dimension_numbers<[1], [0], [0], [1], [0, 0, 1, 1], [], []>} : vector<4x8xf32>, vector<8x4xf32>, vector<4x4xf32> -> vector<4x4xf32>
    %c0_80 = arith.constant 0 : index
    %c0_81 = arith.constant 0 : index
    %179 = vector.load %arg8[%c0_80, %c0_81] : memref<4x4xf32, #tpu.memory_space<vmem>>, vector<4x4xf32>
    %180 = arith.mulf %177, %179 : vector<4x4xf32>
    %181 = vector.shape_cast %180 : vector<4x4xf32> to vector<1x4x4xf32>
    %cst_82 = arith.constant dense<0.000000e+00> : vector<1xf32>
    %182 = vector.multi_reduction <add>, %181, %cst_82 [1, 2] : vector<1x4x4xf32> to vector<1xf32>
    %183 = vector.shape_cast %182 : vector<1xf32> to vector<1x1x1xf32>
    %184 = vector.extract %183[0, 0, 0] : f32 from vector<1x1x1xf32>
    %185 = arith.mulf %178, %179 : vector<4x4xf32>
    %186 = vector.shape_cast %185 : vector<4x4xf32> to vector<1x4x4xf32>
    %cst_83 = arith.constant dense<0.000000e+00> : vector<1xf32>
    %187 = vector.multi_reduction <add>, %186, %cst_83 [1, 2] : vector<1x4x4xf32> to vector<1xf32>
    %188 = vector.shape_cast %187 : vector<1xf32> to vector<1x1x1xf32>
    %189 = vector.extract %188[0, 0, 0] : f32 from vector<1x1x1xf32>
    %190 = arith.mulf %177, %177 : vector<4x4xf32>
    %191 = arith.mulf %190, %179 : vector<4x4xf32>
    %192 = vector.shape_cast %191 : vector<4x4xf32> to vector<1x4x4xf32>
    %cst_84 = arith.constant dense<0.000000e+00> : vector<1xf32>
    %193 = vector.multi_reduction <add>, %192, %cst_84 [1, 2] : vector<1x4x4xf32> to vector<1xf32>
    %194 = vector.shape_cast %193 : vector<1xf32> to vector<1x1x1xf32>
    %195 = vector.extract %194[0, 0, 0] : f32 from vector<1x1x1xf32>
    %196 = arith.mulf %178, %178 : vector<4x4xf32>
    %197 = arith.mulf %196, %179 : vector<4x4xf32>
    %198 = vector.shape_cast %197 : vector<4x4xf32> to vector<1x4x4xf32>
    %cst_85 = arith.constant dense<0.000000e+00> : vector<1xf32>
    %199 = vector.multi_reduction <add>, %198, %cst_85 [1, 2] : vector<1x4x4xf32> to vector<1xf32>
    %200 = vector.shape_cast %199 : vector<1xf32> to vector<1x1x1xf32>
    %201 = vector.extract %200[0, 0, 0] : f32 from vector<1x1x1xf32>
    %202 = arith.mulf %177, %178 : vector<4x4xf32>
    %203 = arith.mulf %202, %179 : vector<4x4xf32>
    %204 = vector.shape_cast %203 : vector<4x4xf32> to vector<1x4x4xf32>
    %cst_86 = arith.constant dense<0.000000e+00> : vector<1xf32>
    %205 = vector.multi_reduction <add>, %204, %cst_86 [1, 2] : vector<1x4x4xf32> to vector<1xf32>
    %206 = vector.shape_cast %205 : vector<1xf32> to vector<1x1x1xf32>
    %207 = vector.extract %206[0, 0, 0] : f32 from vector<1x1x1xf32>
    %208 = arith.mulf %184, %184 : f32
    %209 = arith.mulf %189, %189 : f32
    %210 = arith.mulf %184, %189 : f32
    %211 = arith.subf %195, %208 : f32
    %212 = arith.subf %201, %209 : f32
    %213 = arith.subf %207, %210 : f32
    %cst_87 = arith.constant 2.000000e+00 : f32
    %214 = arith.mulf %cst_87, %213 : f32
    %cst_88 = arith.constant 8.99999984E-4 : f32
    %215 = arith.addf %214, %cst_88 : f32
    %216 = arith.addf %211, %212 : f32
    %cst_89 = arith.constant 8.99999984E-4 : f32
    %217 = arith.addf %216, %cst_89 : f32
    %218 = arith.divf %215, %217 : f32
    %cst_90 = arith.constant 2.000000e+00 : f32
    %219 = arith.mulf %cst_90, %210 : f32
    %cst_91 = arith.constant 9.99999974E-5 : f32
    %220 = arith.addf %219, %cst_91 : f32
    %221 = arith.mulf %218, %220 : f32
    %222 = arith.addf %208, %209 : f32
    %cst_92 = arith.constant 9.99999974E-5 : f32
    %223 = arith.addf %222, %cst_92 : f32
    %224 = arith.divf %221, %223 : f32
    %c3_i32 = arith.constant 3 : i32
    %225 = vector.broadcast %c3_i32 : i32 to vector<1x6xi32>
    %226 = arith.cmpi eq, %4, %225 : vector<1x6xi32>
    %227 = vector.broadcast %224 : f32 to vector<1xf32>
    %cst_93 = arith.constant dense<0.000000e+00> : vector<1xf32>
    %228 = vector.multi_reduction <add>, %227, %cst_93 [] : vector<1xf32> to vector<1xf32>
    %229 = vector.extract %228[0] : f32 from vector<1xf32>
    %cst_94 = arith.constant 0.000000e+00 : f32
    %230 = vector.broadcast %229 : f32 to vector<1x6xf32>
    %231 = vector.broadcast %cst_94 : f32 to vector<1x6xf32>
    %232 = arith.select %226, %230, %231 : vector<1x6xi1>, vector<1x6xf32>
    %233 = arith.addf %172, %232 : vector<1x6xf32>
    %c0_95 = arith.constant 0 : index
    %c0_96 = arith.constant 0 : index
    %234 = vector.load %arg16[%c0_95, %c0_96] : memref<2x4xf32, #tpu.memory_space<vmem>>, vector<2x4xf32>
    %c0_97 = arith.constant 0 : index
    %c0_98 = arith.constant 0 : index
    %235 = vector.load %arg17[%c0_97, %c0_98] : memref<4x2xf32, #tpu.memory_space<vmem>>, vector<4x2xf32>
    %cst_99 = arith.constant dense<0.000000e+00> : vector<4x2xf32>
    %236 = tpu.matmul %177, %235, %cst_99 {dimension_numbers = #tpu.dot_dimension_numbers<[1], [0], [0], [1], [0, 0, 1, 1], [], []>} : vector<4x4xf32>, vector<4x2xf32>, vector<4x2xf32> -> vector<4x2xf32>
    %cst_100 = arith.constant dense<0.000000e+00> : vector<4x2xf32>
    %237 = tpu.matmul %178, %235, %cst_100 {dimension_numbers = #tpu.dot_dimension_numbers<[1], [0], [0], [1], [0, 0, 1, 1], [], []>} : vector<4x4xf32>, vector<4x2xf32>, vector<4x2xf32> -> vector<4x2xf32>
    %cst_101 = arith.constant dense<0.000000e+00> : vector<2x2xf32>
    %238 = tpu.matmul %234, %236, %cst_101 {dimension_numbers = #tpu.dot_dimension_numbers<[1], [0], [0], [1], [0, 0, 1, 1], [], []>} : vector<2x4xf32>, vector<4x2xf32>, vector<2x2xf32> -> vector<2x2xf32>
    %cst_102 = arith.constant dense<0.000000e+00> : vector<2x2xf32>
    %239 = tpu.matmul %234, %237, %cst_102 {dimension_numbers = #tpu.dot_dimension_numbers<[1], [0], [0], [1], [0, 0, 1, 1], [], []>} : vector<2x4xf32>, vector<4x2xf32>, vector<2x2xf32> -> vector<2x2xf32>
    %c0_103 = arith.constant 0 : index
    %c0_104 = arith.constant 0 : index
    %240 = vector.load %arg9[%c0_103, %c0_104] : memref<2x2xf32, #tpu.memory_space<vmem>>, vector<2x2xf32>
    %241 = arith.mulf %238, %240 : vector<2x2xf32>
    %242 = vector.shape_cast %241 : vector<2x2xf32> to vector<1x2x2xf32>
    %cst_105 = arith.constant dense<0.000000e+00> : vector<1xf32>
    %243 = vector.multi_reduction <add>, %242, %cst_105 [1, 2] : vector<1x2x2xf32> to vector<1xf32>
    %244 = vector.shape_cast %243 : vector<1xf32> to vector<1x1x1xf32>
    %245 = vector.extract %244[0, 0, 0] : f32 from vector<1x1x1xf32>
    %246 = arith.mulf %239, %240 : vector<2x2xf32>
    %247 = vector.shape_cast %246 : vector<2x2xf32> to vector<1x2x2xf32>
    %cst_106 = arith.constant dense<0.000000e+00> : vector<1xf32>
    %248 = vector.multi_reduction <add>, %247, %cst_106 [1, 2] : vector<1x2x2xf32> to vector<1xf32>
    %249 = vector.shape_cast %248 : vector<1xf32> to vector<1x1x1xf32>
    %250 = vector.extract %249[0, 0, 0] : f32 from vector<1x1x1xf32>
    %251 = arith.mulf %238, %238 : vector<2x2xf32>
    %252 = arith.mulf %251, %240 : vector<2x2xf32>
    %253 = vector.shape_cast %252 : vector<2x2xf32> to vector<1x2x2xf32>
    %cst_107 = arith.constant dense<0.000000e+00> : vector<1xf32>
    %254 = vector.multi_reduction <add>, %253, %cst_107 [1, 2] : vector<1x2x2xf32> to vector<1xf32>
    %255 = vector.shape_cast %254 : vector<1xf32> to vector<1x1x1xf32>
    %256 = vector.extract %255[0, 0, 0] : f32 from vector<1x1x1xf32>
    %257 = arith.mulf %239, %239 : vector<2x2xf32>
    %258 = arith.mulf %257, %240 : vector<2x2xf32>
    %259 = vector.shape_cast %258 : vector<2x2xf32> to vector<1x2x2xf32>
    %cst_108 = arith.constant dense<0.000000e+00> : vector<1xf32>
    %260 = vector.multi_reduction <add>, %259, %cst_108 [1, 2] : vector<1x2x2xf32> to vector<1xf32>
    %261 = vector.shape_cast %260 : vector<1xf32> to vector<1x1x1xf32>
    %262 = vector.extract %261[0, 0, 0] : f32 from vector<1x1x1xf32>
    %263 = arith.mulf %238, %239 : vector<2x2xf32>
    %264 = arith.mulf %263, %240 : vector<2x2xf32>
    %265 = vector.shape_cast %264 : vector<2x2xf32> to vector<1x2x2xf32>
    %cst_109 = arith.constant dense<0.000000e+00> : vector<1xf32>
    %266 = vector.multi_reduction <add>, %265, %cst_109 [1, 2] : vector<1x2x2xf32> to vector<1xf32>
    %267 = vector.shape_cast %266 : vector<1xf32> to vector<1x1x1xf32>
    %268 = vector.extract %267[0, 0, 0] : f32 from vector<1x1x1xf32>
    %269 = arith.mulf %245, %245 : f32
    %270 = arith.mulf %250, %250 : f32
    %271 = arith.mulf %245, %250 : f32
    %272 = arith.subf %256, %269 : f32
    %273 = arith.subf %262, %270 : f32
    %274 = arith.subf %268, %271 : f32
    %cst_110 = arith.constant 2.000000e+00 : f32
    %275 = arith.mulf %cst_110, %274 : f32
    %cst_111 = arith.constant 8.99999984E-4 : f32
    %276 = arith.addf %275, %cst_111 : f32
    %277 = arith.addf %272, %273 : f32
    %cst_112 = arith.constant 8.99999984E-4 : f32
    %278 = arith.addf %277, %cst_112 : f32
    %279 = arith.divf %276, %278 : f32
    %cst_113 = arith.constant 2.000000e+00 : f32
    %280 = arith.mulf %cst_113, %271 : f32
    %cst_114 = arith.constant 9.99999974E-5 : f32
    %281 = arith.addf %280, %cst_114 : f32
    %282 = arith.mulf %279, %281 : f32
    %283 = arith.addf %269, %270 : f32
    %cst_115 = arith.constant 9.99999974E-5 : f32
    %284 = arith.addf %283, %cst_115 : f32
    %285 = arith.divf %282, %284 : f32
    %c4_i32 = arith.constant 4 : i32
    %286 = vector.broadcast %c4_i32 : i32 to vector<1x6xi32>
    %287 = arith.cmpi eq, %4, %286 : vector<1x6xi32>
    %288 = vector.broadcast %285 : f32 to vector<1xf32>
    %cst_116 = arith.constant dense<0.000000e+00> : vector<1xf32>
    %289 = vector.multi_reduction <add>, %288, %cst_116 [] : vector<1xf32> to vector<1xf32>
    %290 = vector.extract %289[0] : f32 from vector<1xf32>
    %cst_117 = arith.constant 0.000000e+00 : f32
    %291 = vector.broadcast %290 : f32 to vector<1x6xf32>
    %292 = vector.broadcast %cst_117 : f32 to vector<1x6xf32>
    %293 = arith.select %287, %291, %292 : vector<1x6xi1>, vector<1x6xf32>
    %294 = arith.addf %233, %293 : vector<1x6xf32>
    %c5_i32 = arith.constant 5 : i32
    %295 = vector.broadcast %c5_i32 : i32 to vector<1x6xi32>
    %296 = arith.cmpi eq, %4, %295 : vector<1x6xi32>
    %297 = vector.broadcast %279 : f32 to vector<1xf32>
    %cst_118 = arith.constant dense<0.000000e+00> : vector<1xf32>
    %298 = vector.multi_reduction <add>, %297, %cst_118 [] : vector<1xf32> to vector<1xf32>
    %299 = vector.extract %298[0] : f32 from vector<1xf32>
    %cst_119 = arith.constant 0.000000e+00 : f32
    %300 = vector.broadcast %299 : f32 to vector<1x6xf32>
    %301 = vector.broadcast %cst_119 : f32 to vector<1x6xf32>
    %302 = arith.select %296, %300, %301 : vector<1x6xi1>, vector<1x6xf32>
    %303 = arith.addf %294, %302 : vector<1x6xf32>
    %c0_120 = arith.constant 0 : index
    %c0_121 = arith.constant 0 : index
    %c0_122 = arith.constant 0 : index
    %304 = vector.load %arg18[%c0_120, %c0_121, %c0_122] : memref<1x1x6xf32, #tpu.memory_space<vmem>>, vector<1x1x6xf32>
    %305 = vector.shape_cast %304 : vector<1x1x6xf32> to vector<1x6xf32>
    %306 = vector.shape_cast %303 : vector<1x6xf32> to vector<1x1x6xf32>
    tpu.vector_store %arg18[%c0_120, %c0_121, %c0_122], %306 {strides = array<i32>} : memref<1x1x6xf32, #tpu.memory_space<vmem>>, vector<1x1x6xf32>,
    return
  }
  func.func @transform_0(%arg0: i32) -> (i32, i32, i32) {
    %c0_i32 = arith.constant 0 : i32
    %c0_i32_0 = arith.constant 0 : i32
    %c0_i32_1 = arith.constant 0 : i32
    return %arg0, %c0_i32, %c0_i32_0 : i32, i32, i32
  }
  func.func @transform_1(%arg0: i32) -> (i32, i32, i32) {
    %c0_i32 = arith.constant 0 : i32
    %c0_i32_0 = arith.constant 0 : i32
    %c0_i32_1 = arith.constant 0 : i32
    return %arg0, %c0_i32, %c0_i32_0 : i32, i32, i32
  }
  func.func @transform_2(%arg0: i32) -> (i32, i32) {
    %c0_i32 = arith.constant 0 : i32
    %c0_i32_0 = arith.constant 0 : i32
    %c0_i32_1 = arith.constant 0 : i32
    return %c0_i32, %c0_i32_0 : i32, i32
  }
  func.func @transform_3(%arg0: i32) -> (i32, i32) {
    %c0_i32 = arith.constant 0 : i32
    %c0_i32_0 = arith.constant 0 : i32
    %c0_i32_1 = arith.constant 0 : i32
    return %c0_i32, %c0_i32_0 : i32, i32
  }
  func.func @transform_4(%arg0: i32) -> (i32, i32) {
    %c0_i32 = arith.constant 0 : i32
    %c0_i32_0 = arith.constant 0 : i32
    %c0_i32_1 = arith.constant 0 : i32
    return %c0_i32, %c0_i32_0 : i32, i32
  }
  func.func @transform_5(%arg0: i32) -> (i32, i32) {
    %c0_i32 = arith.constant 0 : i32
    %c0_i32_0 = arith.constant 0 : i32
    %c0_i32_1 = arith.constant 0 : i32
    return %c0_i32, %c0_i32_0 : i32, i32
  }
  func.func @transform_6(%arg0: i32) -> (i32, i32) {
    %c0_i32 = arith.constant 0 : i32
    %c0_i32_0 = arith.constant 0 : i32
    %c0_i32_1 = arith.constant 0 : i32
    return %c0_i32, %c0_i32_0 : i32, i32
  }
  func.func @transform_7(%arg0: i32) -> (i32, i32) {
    %c0_i32 = arith.constant 0 : i32
    %c0_i32_0 = arith.constant 0 : i32
    %c0_i32_1 = arith.constant 0 : i32
    return %c0_i32, %c0_i32_0 : i32, i32
  }
  func.func @transform_8(%arg0: i32) -> (i32, i32) {
    %c0_i32 = arith.constant 0 : i32
    %c0_i32_0 = arith.constant 0 : i32
    %c0_i32_1 = arith.constant 0 : i32
    return %c0_i32, %c0_i32_0 : i32, i32
  }
  func.func @transform_9(%arg0: i32) -> (i32, i32) {
    %c0_i32 = arith.constant 0 : i32
    %c0_i32_0 = arith.constant 0 : i32
    %c0_i32_1 = arith.constant 0 : i32
    return %c0_i32, %c0_i32_0 : i32, i32
  }
  func.func @transform_10(%arg0: i32) -> (i32, i32) {
    %c0_i32 = arith.constant 0 : i32
    %c0_i32_0 = arith.constant 0 : i32
    %c0_i32_1 = arith.constant 0 : i32
    return %c0_i32, %c0_i32_0 : i32, i32
  }
  func.func @transform_11(%arg0: i32) -> (i32, i32) {
    %c0_i32 = arith.constant 0 : i32
    %c0_i32_0 = arith.constant 0 : i32
    %c0_i32_1 = arith.constant 0 : i32
    return %c0_i32, %c0_i32_0 : i32, i32
  }
  func.func @transform_12(%arg0: i32) -> (i32, i32) {
    %c0_i32 = arith.constant 0 : i32
    %c0_i32_0 = arith.constant 0 : i32
    %c0_i32_1 = arith.constant 0 : i32
    return %c0_i32, %c0_i32_0 : i32, i32
  }
  func.func @transform_13(%arg0: i32) -> (i32, i32) {
    %c0_i32 = arith.constant 0 : i32
    %c0_i32_0 = arith.constant 0 : i32
    %c0_i32_1 = arith.constant 0 : i32
    return %c0_i32, %c0_i32_0 : i32, i32
  }
  func.func @transform_14(%arg0: i32) -> (i32, i32) {
    %c0_i32 = arith.constant 0 : i32
    %c0_i32_0 = arith.constant 0 : i32
    %c0_i32_1 = arith.constant 0 : i32
    return %c0_i32, %c0_i32_0 : i32, i32
  }
  func.func @transform_15(%arg0: i32) -> (i32, i32) {
    %c0_i32 = arith.constant 0 : i32
    %c0_i32_0 = arith.constant 0 : i32
    %c0_i32_1 = arith.constant 0 : i32
    return %c0_i32, %c0_i32_0 : i32, i32
  }
  func.func @transform_16(%arg0: i32) -> (i32, i32) {
    %c0_i32 = arith.constant 0 : i32
    %c0_i32_0 = arith.constant 0 : i32
    %c0_i32_1 = arith.constant 0 : i32
    return %c0_i32, %c0_i32_0 : i32, i32
  }
  func.func @transform_17(%arg0: i32) -> (i32, i32, i32) {
    %c0_i32 = arith.constant 0 : i32
    %c0_i32_0 = arith.constant 0 : i32
    %c0_i32_1 = arith.constant 0 : i32
    return %arg0, %c0_i32, %c0_i32_0 : i32, i32, i32
  }
}

</mosaic_0001>

<bundles_post_ra>
// kernel: msssim_loss.1
= control target key start
LH: loop header
LB: loop body
LE: loop exit
PB: predicated region body
PF: predicated region fallthrough
CT: control target
= control target key end

     0   :  { %s4106_s0 = inlined_call_operand.hbm [shape: f32[6,32,32], index: 0, kind: input, shape index: {}]   ;;  %s4107_s1 = inlined_call_operand.hbm [shape: f32[6,32,32], index: 1, kind: input, shape index: {}]   ;;  %s4108_s2 = inlined_call_operand.hbm [shape: f32[22,32], index: 2, kind: input, shape index: {}]   ;;  %s4109_s3 = inlined_call_operand.hbm [shape: f32[32,22], index: 3, kind: input, shape index: {}]   ;;  %s4110_s4 = inlined_call_operand.hbm [shape: f32[6,16], index: 4, kind: input, shape index: {}]   ;;  %s4111_s5 = inlined_call_operand.hbm [shape: f32[16,6], index: 5, kind: input, shape index: {}]   ;;  %s4112_s6 = inlined_call_operand.hbm [shape: f32[8,8], index: 6, kind: input, shape index: {}]   ;;  %s4113_s7 = inlined_call_operand.hbm [shape: f32[4,4], index: 7, kind: input, shape index: {}]   ;;  %s4114_s8 = inlined_call_operand.hbm [shape: f32[2,2], index: 8, kind: input, shape index: {}]   ;;  %s4115_s9 = inlined_call_operand.hbm [shape: f32[16,32], index: 9, kind: input, shape index: {}]   ;;  %s4116_s10 = inlined_call_operand.hbm [shape: f32[32,16], index: 10, kind: input, shape index: {}]   ;;  %s4117_s11 = inlined_call_operand.hbm [shape: f32[8,16], index: 11, kind: input, shape index: {}]   ;;  %s4118_s12 = inlined_call_operand.vmem [shape: f32[16,8], index: 12, kind: input, shape index: {}]   ;;  %s4119_s13 = inlined_call_operand.hbm [shape: f32[4,8], index: 13, kind: input, shape index: {}]   ;;  %s4120_s14 = inlined_call_operand.hbm [shape: f32[8,4], index: 14, kind: input, shape index: {}]   ;;  %s4121_s15 = inlined_call_operand.hbm [shape: f32[2,4], index: 15, kind: input, shape index: {}]   ;;  %s4122_s16 = inlined_call_operand.vmem [shape: f32[4,2], index: 16, kind: input, shape index: {}]   ;;  %s4123_s17 = inlined_call_operand.vmem [shape: f32[6,1,6], index: 17, kind: output, shape index: {}]  }
   0x1   :  { %4131 = sst [smem:[#allocation34_spill]] %s4106_s0 }
   0x2   :  { %4132 = sst [smem:[#allocation35_spill]] %s4107_s1 }
   0x3   :  { %4133 = sst [smem:[#allocation36_spill]] %s4108_s2 }
   0x4   :  { %4134 = sst [smem:[#allocation37_spill]] %s4109_s3 }
   0x5   :  { %4135 = sst [smem:[#allocation38_spill]] %s4110_s4 }
   0x6   :  { %4136 = sst [smem:[#allocation39_spill]] %s4111_s5 }
   0x7   :  { %4137 = sst [smem:[#allocation40_spill]] %s4112_s6 }
   0x8   :  { %4138 = sst [smem:[#allocation41_spill]] %s4113_s7 }
   0x9   :  { %4139 = sst [smem:[#allocation42_spill]] %s4114_s8 }
   0xa   :  { %4140 = sst [smem:[#allocation43_spill]] %s4115_s9 }
   0xb   :  { %4141 = sst [smem:[#allocation44_spill]] %s4116_s10 }
   0xc   :  { %4142 = sst [smem:[#allocation45_spill]] %s4117_s11 }
   0xd   :  { %4143 = sst [smem:[#allocation46_spill]] %s4118_s12 }
   0xe   :  { %4144 = sst [smem:[#allocation47_spill]] %s4122_s16 }
   0xf   :  { %4145 = sst [smem:[#allocation48_spill]] %s4123_s17 }
  0x10   :  { %22 = vsyncpa [#allocation3], 0 }
  0x11   :  { %24 = vsyncpa [#allocation3 + $0x1], 0 }
  0x12   :  { %25 = vsyncpa [#allocation5], 0 }
  0x13   :  { %27 = vsyncpa [#allocation5 + $0x1], 0 }
  0x14   :  { %28 = vsyncpa [#allocation8], 0 }
  0x15   :  { %29 = vsyncpa [#allocation11], 0 }
  0x16   :  { %30 = vsyncpa [#allocation14], 0 }
  0x17   :  { %31 = vsyncpa [#allocation17], 0 }
  0x18   :  { %32 = vsyncpa [#allocation20], 0 }
  0x19   :  { %33 = vsyncpa [#allocation23], 0  ;;  %s3469_s24 = smov 0   ;;  %s3471_s25 = smov 0  }
  0x1a   :  { %s3473_s26 = smov 0   ;;  %s3475_s27 = smov 0  }
  0x1b LB: > { %s4146_s2 = sld [smem:[#allocation36_spill]]  ;;  %s3493_s30 = sadd.s32 4294967295, %s3362_s27   ;;  %s3362_s27 = sphi %s3475_s27, %s4186_s27   ;;  %s3358_s26 = sphi %s3473_s26, %s4185_s26   ;;  %s3354_s25 = sphi %s3471_s25, %s4184_s25   ;;  %s3350_s24 = sphi %s3469_s24, %s4183_s24  }
  0x1c   : > { %p2470_p0 = scmp.ge.s32.totalorder %s3362_s27, 1  ;;  %p60_p1 = scmp.eq.s32.totalorder %s3493_s30, 0 }
  0x1d   : > { %p437_p2 = scmp.lt.s32.totalorder %s3362_s27, 7  ;;  %s3364_s19 = smov [#allocation6]  }
  0x1e   : > { %s450_s1 = sshll.u32 %s3364_s19, 4  ;;  %s4148_s3 = sld [smem:[#allocation37_spill]]  ;;  %s451_s1 = int_to_ptr.vmem [resolvable:$true] %s450_s1 }
  0x1f   : > { %p3498_p3 = pnand %p2470_p0, %p437_p2  ;;  %s4150_s5 = sld [smem:[#allocation39_spill]] }
  0x20   : > { %s4127_s16 = smov 128   ;;  %s4129_s12 = smov 8  }
  0x21   : > { %s448_s0 = sshll.u32 %s4146_s2, 4  ;;  %p2697_p4 = pneg %p3498_p3  ;;  %s449_s0 = int_to_ptr.hbm [resolvable:$true] %s448_s0 }
  0x22   : > { %s3365_s2 = smov [#allocation7]   ;;  %s4151_s7 = sld [smem:[#allocation41_spill]] }
  0x23   : > { %p3509_p5 = pnand %p2697_p4, %p60_p1  ;;  %s464_s17 = sshll.u32 %s3365_s2, 4  ;;  %s465_s17 = int_to_ptr.vmem [resolvable:$true] %s464_s17 }
  0x24   : > { %s462_s22 = sshll.u32 %s4148_s3, 4  ;;  %s3368_s2 = smov [#allocation10]   ;;  %s463_s22 = int_to_ptr.hbm [resolvable:$true] %s462_s22 }
  0x25   : > { %s488_s19 = sshll.u32 %s4150_s5, 4  ;;  %s490_s29 = sshll.u32 %s3368_s2, 4  ;;  %s489_s19 = int_to_ptr.hbm [resolvable:$true] %s488_s19  ;;  %s491_s29 = int_to_ptr.vmem [resolvable:$true] %s490_s29 }
  0x26   : > { %2700 = dma.hbm_to_vmem [thread:$0]  (!%p3509_p5), %s449_s0, 384, %s451_s1, [#allocation5], %s4127_s16, %s4127_s16, %s4129_s12  }
  0x27   : > { %2703 = dma.hbm_to_vmem [thread:$0]  (!%p3509_p5), %s463_s22, 512, %s465_s17, [#allocation8], %s4127_s16, %s4127_s16, %s4129_s12  }
  0x28   : > { %s515_s28 = sshll.u32 %s4151_s7, 4  ;;  %s3369_s0 = smov [#allocation13]   ;;  %s516_s28 = int_to_ptr.hbm [resolvable:$true] %s515_s28 }
  0x29   : > { %2709 = dma.hbm_to_vmem [thread:$0]  (!%p3509_p5), %s489_s19, 256, %s491_s29, [#allocation11], %s4127_s16, %s4127_s16, %s4129_s12  }
  0x2a   : > { %s517_s1 = sshll.u32 %s3369_s0, 4  ;;  %s4152_s9 = sld [smem:[#allocation43_spill]]  ;;  %s518_s1 = int_to_ptr.vmem [resolvable:$true] %s517_s1 }
  0x2b   : > { %2715 = dma.hbm_to_vmem [thread:$0]  (!%p3509_p5), %s516_s28, 64, %s518_s1, [#allocation14]  }
  0x2c   : > { %s4153_s11 = sld [smem:[#allocation45_spill]]  ;;  %s3370_s2 = smov [#allocation16]  }
  0x2d   : > { %s540_s7 = sshll.u32 %s3370_s2, 4  ;;  %s3371_s3 = smov [#allocation19]   ;;  %s541_s7 = int_to_ptr.vmem [resolvable:$true] %s540_s7 }
  0x2e   : > { %s569_s5 = sshll.u32 %s3371_s3, 4  ;;  %s594_s28 = sshll.u32 %s4120_s14, 4  ;;  %s570_s5 = int_to_ptr.vmem [resolvable:$true] %s569_s5  ;;  %s595_s28 = int_to_ptr.hbm [resolvable:$true] %s594_s28 }
  0x2f   : > { %s4154_s4 = sld [smem:[#allocation38_spill]]  ;;  %s3372_s20 = smov [#allocation22]  }
  0x30   : > { %s538_s17 = sshll.u32 %s4152_s9, 4  ;;  %s596_s2 = sshll.u32 %s3372_s20, 4  ;;  %s539_s17 = int_to_ptr.hbm [resolvable:$true] %s538_s17  ;;  %s597_s2 = int_to_ptr.vmem [resolvable:$true] %s596_s2 }
  0x31   : > { %2721 = dma.hbm_to_vmem [thread:$0]  (!%p3509_p5), %s539_s17, 256, %s541_s7, [#allocation17], %s4127_s16, %s4127_s16, %s4129_s12  }
  0x32   : > { %s567_s21 = sshll.u32 %s4153_s11, 4  ;;  %s3373_s7 = smov [#allocation9]   ;;  %s568_s21 = int_to_ptr.hbm [resolvable:$true] %s567_s21 }
  0x33   : > { %2727 = dma.hbm_to_vmem [thread:$0]  (!%p3509_p5), %s568_s21, 128, %s570_s5, [#allocation20]  }
  0x34   : > { %2733 = dma.hbm_to_vmem [thread:$0]  (!%p3509_p5), %s595_s28, 128, %s597_s2, [#allocation23]  }
  0x35   : > { %s477_s22 = sshll.u32 %s4154_s4, 4  ;;  %s479_s17 = sshll.u32 %s3373_s7, 4  ;;  %s478_s22 = int_to_ptr.hbm [resolvable:$true] %s477_s22  ;;  %s480_s17 = int_to_ptr.vmem [resolvable:$true] %s479_s17 }
  0x36   : > { %s4155_s6 = sld [smem:[#allocation40_spill]]  ;;  %s3374_s1 = smov [#allocation12]  }
  0x37   : > { %2706 = dma.hbm_to_vmem [thread:$0]  (!%p3509_p5), %s478_s22, 128, %s480_s17, [#allocation8]  }
  0x38   : > { %s4156_s8 = sld [smem:[#allocation42_spill]]  ;;  %s505_s20 = sshll.u32 %s3374_s1, 4  ;;  %s506_s20 = int_to_ptr.vmem [resolvable:$true] %s505_s20 }
  0x39   : > { %s3375_s28 = smov [#allocation15]   ;;  %s4157_s10 = sld [smem:[#allocation44_spill]] }
  0x3a   : > { %s529_s2 = sshll.u32 %s3375_s28, 4  ;;  %s582_s21 = sshll.u32 %s4119_s13, 4  ;;  %s530_s2 = int_to_ptr.vmem [resolvable:$true] %s529_s2  ;;  %s583_s21 = int_to_ptr.hbm [resolvable:$true] %s582_s21 }
  0x3b   : > { %s3376_s5 = smov [#allocation18]   ;;  %s3378_s7 = smov [#allocation24]  }
  0x3c   : > { %s503_s29 = sshll.u32 %s4155_s6, 4  ;;  %s608_s3 = sshll.u32 %s3378_s7, 4  ;;  %s504_s29 = int_to_ptr.hbm [resolvable:$true] %s503_s29  ;;  %s609_s3 = int_to_ptr.vmem [resolvable:$true] %s608_s3 }
  0x3d   : > { %2712 = dma.hbm_to_vmem [thread:$0]  (!%p3509_p5), %s504_s29, 128, %s506_s20, [#allocation11]  }
  0x3e   : > { %s527_s0 = sshll.u32 %s4156_s8, 4  ;;  %s554_s29 = sshll.u32 %s3376_s5, 4  ;;  %s528_s0 = int_to_ptr.hbm [resolvable:$true] %s527_s0  ;;  %s555_s29 = int_to_ptr.vmem [resolvable:$true] %s554_s29 }
  0x3f   : > { %s552_s19 = sshll.u32 %s4157_s10, 4  ;;  %s46_s17 = sadd.s32 1, %s3358_s26  ;;  %s553_s19 = int_to_ptr.hbm [resolvable:$true] %s552_s19 }
  0x40   : > { %2718 = dma.hbm_to_vmem [thread:$0]  (!%p3509_p5), %s528_s0, 32, %s530_s2, [#allocation14]  }
  0x41   : > { %2724 = dma.hbm_to_vmem [thread:$0]  (!%p3509_p5), %s553_s19, 512, %s555_s29, [#allocation17], %s4127_s16, %s4127_s16, %s4129_s12  }
  0x42   : > { %s3377_s0 = smov [#allocation21]   ;;  %s606_s2 = sshll.u32 %s4121_s15, 4  ;;  %s607_s2 = int_to_ptr.hbm [resolvable:$true] %s606_s2 }
  0x43   : > { %s584_s1 = sshll.u32 %s3377_s0, 4  ;;  %s3588_s19 = sadd.s32 1, %s3362_s27   ;;  %s585_s1 = int_to_ptr.vmem [resolvable:$true] %s584_s1 }
  0x44   : > { %2730 = dma.hbm_to_vmem [thread:$0]  (!%p3509_p5), %s583_s21, 64, %s585_s1, [#allocation20]  }
  0x45   : > { %2736 = dma.hbm_to_vmem [thread:$0]  (!%p3509_p5), %s607_s2, 32, %s609_s3, [#allocation23]  }
  0x46   : > { %s43_s22 = ssub.s32 %s3362_s27, %s3588_s19  ;;  %p53_p7 = scmp.ne.s32.totalorder %s3358_s26, %s3354_s25 }
  0x47   : > { %p44_p6 = scmp.eq.s32.totalorder %s43_s22, 0  ;;  %p54_p8 = scmp.eq.s32.totalorder %s3362_s27, 0 }
  0x48   : > { %p59_p9 = scmp.ne.s32.totalorder %s3354_s25, %s3350_s24  ;;  %p2757_p12 = scmp.lt.s32.totalorder %s3362_s27, 6 }
  0x49   : > { %s3599_s5 = scalar_select %p44_p6, %s3358_s26, %s46_s17  }
  0x4a   : > { %p55_p10 = por %p54_p8, %p53_p7  ;;  %p3603_p11 = por %p60_p1, %p59_p9 }
  0x4b   : > { %s622_s23 = sand.u32 1, %s3358_s26   ;;  %s2589_s0 = sshll.u32 %s3362_s27, 5 }
  0x4c   : > { %s3609_s29 = sshll.u32 %s622_s23, 5  ;;  %s4159_s28 = sld [smem:[#allocation34_spill]] }
  0x4d   : > { %s626_s7 = scalar_lea.vmem [#allocation2], %s3609_s29  ;;  %p3616_p13 = pnand %p2757_p12, %p55_p10 }
  0x4e   : > { %s634_s24 = sshll.u32 %s626_s7, 4  ;;  %s4161_s12 = sld [smem:[#allocation35_spill]]  ;;  %s635_s24 = int_to_ptr.vmem [resolvable:$true] %s634_s24 }
  0x4f   : > { %s623_s8 = scalar_lea.sflag [#allocation3], %s622_s23  ;;  %p3240_p2 = pneg %p3616_p13 }
  0x52   : > { %s631_s2 = scalar_lea.hbm %s4159_s28, %s2589_s0  ;;  %s3243_s7 = scalar_lea.hbm %s4159_s28, 192 }
  0x53   : > { %s632_s3 = sshll.u32 %s631_s2, 4  ;;  %s633_s3 = int_to_ptr.hbm [resolvable:$true] %s632_s3 }
  0x54   : > { %s653_s4 = scalar_lea.hbm %s4161_s12, %s2589_s0  ;;  %s3236_s9 = sshra.s32 %s633_s3, 4  ;;  %s3237_s9 = int_to_ptr.hbm [resolvable:$true] %s3236_s9 }
  0x55   : > { %s654_s6 = sshll.u32 %s653_s4, 4  ;;  %s3238_s1 = scalar_lea.hbm %s3237_s9, 32  ;;  %s655_s6 = int_to_ptr.hbm [resolvable:$true] %s654_s6 }
  0x56   : > { %p3239_p0 = scmp.ne.s32.totalorder %s3237_s9, %s3238_s1  ;;  %p3244_p6 = scmp.lt.s32.totalorder %s3237_s9, %s4159_s28 }
  0x57   : > { %p3245_p7 = scmp.lt.s32.totalorder %s3243_s7, %s3238_s1 }
  0x58   : > { %p3241_p4 = pnand %p3240_p2, %p3239_p0 }
  0x59   : > { %p3246_p8 = por %p3245_p7, %p3244_p6 }
  0x5a   : > { %p3242_p5 = pneg %p3241_p4 }
  0x5c   : > { %p3247_p9 = pnand %p3246_p8, %p3242_p5 }
  0x5e   : > { %3250 = shalt.err (!%p3247_p9)
}
  0x5f   : > { %s4162_s4 = smov 8   ;;  %s4163_s23 = smov 128  }
  0x60   : > { %2740 = dma.hbm_to_vmem [thread:$0]  (!%p3616_p13), %s633_s3, 512, %s635_s24, %s623_s8, %s4163_s23, %s4163_s23, %s4162_s4  }
  0x61   : > { %s648_s0 = scalar_lea.vmem [#allocation4], %s3609_s29  ;;  %s644_s2 = sand.u32 1, %s3362_s27  }
  0x62   : > { %s656_s20 = sshll.u32 %s648_s0, 4  ;;  %s645_s16 = scalar_lea.sflag [#allocation5], %s644_s2  ;;  %s657_s20 = int_to_ptr.vmem [resolvable:$true] %s656_s20 }
  0x63   : > { %s3266_s9 = sshra.s32 %s655_s6, 4  ;;  %s3273_s10 = scalar_lea.hbm %s4161_s12, 192  ;;  %s3267_s9 = int_to_ptr.hbm [resolvable:$true] %s3266_s9 }
  0x64   : > { %s3268_s1 = scalar_lea.hbm %s3267_s9, 32  ;;  %p3274_p4 = scmp.lt.s32.totalorder %s3267_s9, %s4161_s12 }
  0x65   : > { %p3269_p10 = scmp.ne.s32.totalorder %s3267_s9, %s3268_s1  ;;  %p3275_p5 = scmp.lt.s32.totalorder %s3273_s10, %s3268_s1 }
  0x67   : > { %p3271_p12 = pnand %p3269_p10, %p3240_p2  ;;  %p3276_p6 = por %p3275_p5, %p3274_p4 }
  0x69   : > { %p3272_p0 = pneg %p3271_p12 }
  0x6b   : > { %p3277_p7 = pnand %p3276_p6, %p3272_p0 }
  0x6d   : > { %3280 = shalt.err (!%p3277_p7)
}
  0x6e   : > { %2743 = dma.hbm_to_vmem [thread:$0]  (!%p3616_p13), %s655_s6, 512, %s657_s20, %s645_s16, %s4163_s23, %s4163_s23, %s4162_s4  }
  0x6f   : > { %668 = sbr.rel (%p3498_p3) target bundleno = 1983 (0x7bf), region = 88  ;;  %s670_s27 = sand.u32 (!%p3498_p3), 1, %s3354_s25  }
  0x70   : > { %s2492_s29 = sshll.u32 (!%p3498_p3), %s670_s27, 5  ;;  %s671_s24 = scalar_lea.sflag (!%p3498_p3), [#allocation3], %s670_s27 }
  0x71   : > { %s3658_s11 = scalar_lea.vmem (!%p3498_p3), [#allocation2], %s2492_s29 }
  0x74   : > { %3313 = dma.done.wait (%p3603_p11), %s671_s24, 512  }
  0x75   : > { %3315 = vsyncadd (%p3603_p11), %s671_s24, 4294966784  ;;  %s680_s10 = sand.u32 1, %s3493_s30   ;;  %s3665_s6 = scalar_lea.vmem [#allocation4], %s2492_s29 }
  0x76   : > { %s681_s3 = scalar_lea.sflag [#allocation5], %s680_s10 }
  0x77   : > { %3317 = dma.done.wait (%p3603_p11), %s681_s3, 512  }
  0x78   : > { %3319 = vsyncadd (%p3603_p11), %s681_s3, 4294966784 }
  0x79   : > { %3321 = dma.done.wait (%p60_p1), [#allocation5], 384  }
  0x7a   : > { %3323 = vsyncadd (%p60_p1), [#allocation5], 4294966912 }
  0x7b   : > { %3325 = dma.done.wait (%p60_p1), [#allocation8], 640  }
  0x7c   : > { %3327 = vsyncadd (%p60_p1), [#allocation8], 4294966656 }
  0x7d   : > { %3329 = dma.done.wait (%p60_p1), [#allocation11], 384  }
  0x7e   : > { %3331 = vsyncadd (%p60_p1), [#allocation11], 4294966912 }
  0x7f   : > { %3333 = dma.done.wait (%p60_p1), [#allocation14], 96  }
  0x80   : > { %3335 = vsyncadd (%p60_p1), [#allocation14], 4294967200 }
  0x81   : > { %3337 = dma.done.wait (%p60_p1), [#allocation17], 768  }
  0x82   : > { %3339 = vsyncadd (%p60_p1), [#allocation17], 4294966528 }
  0x83   : > { %3341 = dma.done.wait (%p60_p1), [#allocation20], 192  }
  0x84   : > { %3343 = vsyncadd (%p60_p1), [#allocation20], 4294967104 }
  0x85   : > { %3345 = dma.done.wait (%p60_p1), [#allocation23], 160  }
  0x86   : > { %3347 = vsyncadd (%p60_p1), [#allocation23], 4294967136  ;;  %v823_v0 = vld [vmem:[#allocation7 + $0x18] sm:$0xff]  ;;  %v822_v1 = vld [vmem:[#allocation7 + $0x10] sm:$0xff]  ;;  %vm836_vm0 = vcmask 261120   ;;  %s4180_s22 = sld [smem:[#allocation46_spill]] }
  0x87   : > { %909 = vmatpush.msra.mxu0 %v823_v0  ;;  %2591 = vmatpush.msra.mxu3 %v823_v0  ;;  %v821_v2 = vld [vmem:[#allocation7 + $0x8] sm:$0xff]  ;;  %v820_v3 = vld [vmem:[#allocation7] sm:$0xff]  ;;  %v3705_v5 = vld [vmem:[%s3658_s11 + $0x8] sm:$0xff]  ;;  %s4181_s21 = sld [smem:[#allocation47_spill]]  ;;  %p804_p1 = scmp.lt.s32.totalorder %s3493_s30, 5 }
  0x88   : > { %v3700_v4 = vld [vmem:[%s3658_s11] sm:$0xff]  ;;  %v3710_v6 = vld [vmem:[%s3658_s11 + $0x10] sm:$0xff]  ;;  %v3715_v7 = vld [vmem:[%s3658_s11 + $0x18] sm:$0xff]  ;;  %v825_v13 = vmul.f32 %v3705_v5, %v3705_v5 }
  0x89   : > { %910 = vmatpush.msra.mxu0 %v822_v1  ;;  %2592 = vmatpush.msra.mxu3 %v822_v1  ;;  %v3720_v8 = vld [vmem:[%s3665_s6] sm:$0xff]  ;;  %v3725_v9 = vld [vmem:[%s3665_s6 + $0x8] sm:$0xff]  ;;  %v3730_v10 = vld [vmem:[%s3665_s6 + $0x10] sm:$0xff]  ;;  %v824_v12 = vmul.f32 %v3700_v4, %v3700_v4  ;;  %v826_v14 = vmul.f32 %v3710_v6, %v3710_v6  ;;  %v827_v15 = vmul.f32 %v3715_v7, %v3715_v7  ;;  %s4188_s30 = smov (!%p804_p1, %s3493_s30), 5 }
  0x8a   : > { %v3735_v11 = vld [vmem:[%s3665_s6 + $0x18] sm:$0xff]  ;;  %v828_v16 = vmul.f32 %v3720_v8, %v3720_v8  ;;  %v829_v17 = vmul.f32 %v3725_v9, %v3725_v9  ;;  %v830_v19 = vmul.f32 %v3730_v10, %v3730_v10  ;;  %v832_v21 = vmul.f32 %v3720_v8, %v3700_v4  ;;  %v817_v31 = vld [vmem:[#allocation6] sm:$0xff]  ;;  %v818_v33 = vld [vmem:[#allocation6 + $0x8] sm:$0xff] }
  0x8b   : > { %911 = vmatpush.msra.mxu0 %v821_v2  ;;  %2593 = vmatpush.msra.mxu3 %v821_v2  ;;  %v835_v18 = vmul.f32 %v3735_v11, %v3715_v7  ;;  %v831_v20 = vmul.f32 %v3735_v11, %v3735_v11  ;;  %v833_v23 = vmul.f32 %v3725_v9, %v3705_v5  ;;  %v819_v35 = vld [vmem:[#allocation6 + $0x10] sm:$0x3f]  ;;  %v1273_v39 = vld [vmem:[#allocation18 + $0x18] sm:$0xff]  ;;  %v1272_v41 = vld [vmem:[#allocation18 + $0x10] sm:$0xff] }
  0x8c   : > { %v834_v25 = vmul.f32 %v3730_v10, %v3710_v6  ;;  %v1271_v42 = vld [vmem:[#allocation18 + $0x8] sm:$0xff]  ;;  %v1270_v43 = vld [vmem:[#allocation18] sm:$0xff] }
  0x8d   : > { %912 = vmatpush.msra.mxu0 %v820_v3  ;;  %2594 = vmatpush.msra.mxu3 %v820_v3 }
  0x8e   : > { %2507 = vmatmul.msk.f32.vlgmr.msra.gmra.mxu0 %vm836_vm0, %v3700_v4  ;;  %2526 = vmatmul.msk.f32.vlgmr.msra.gmra.mxu3 %vm836_vm0, %v835_v18 }
  0x96   : > { %2508 = vmatmul.msk.f32.gmra.mxu0 %vm836_vm0, %v3705_v5 }
  0x9e   : > { %2509 = vmatmul.msk.f32.gmra.mxu0 %vm836_vm0, %v3710_v6 }
  0xa6   : > { %2510 = vmatmul.msk.f32.gmra.mxu0 %vm836_vm0, %v3715_v7 }
  0xae   : > { %2511 = vmatmul.msk.f32.gmra.mxu0 %vm836_vm0, %v3720_v8 }
  0xb6   : > { %2512 = vmatmul.msk.f32.gmra.mxu0 %vm836_vm0, %v3725_v9 }
  0xbe   : > { %2513 = vmatmul.msk.f32.gmra.mxu0 %vm836_vm0, %v3730_v10 }
  0xc6   : > { %2514 = vmatmul.msk.f32.gmra.mxu0 %vm836_vm0, %v3735_v11 }
  0xce   : > { %2515 = vmatmul.msk.f32.gmra.mxu0 %vm836_vm0, %v824_v12 }
  0xd6   : > { %2516 = vmatmul.msk.f32.gmra.mxu0 %vm836_vm0, %v825_v13 }
  0xde   : > { %2517 = vmatmul.msk.f32.gmra.mxu0 %vm836_vm0, %v826_v14 }
  0xe6   : > { %2518 = vmatmul.msk.f32.gmra.mxu0 %vm836_vm0, %v827_v15 }
  0xee   : > { %2519 = vmatmul.msk.f32.gmra.mxu0 %vm836_vm0, %v828_v16 }
  0xf6   : > { %2520 = vmatmul.msk.f32.gmra.mxu0 %vm836_vm0, %v829_v17 }
  0xfe   : > { %2521 = vmatmul.msk.f32.gmra.mxu0 %vm836_vm0, %v830_v19 }
 0x106   : > { %2522 = vmatmul.msk.f32.gmra.mxu0 %vm836_vm0, %v831_v20 }
 0x10b   : > { %v914_v22 = vpop.f32.mrf.mxu0 }
 0x10e   : > { %2523 = vmatmul.msk.f32.gmra.mxu0 %vm836_vm0, %v832_v21 }
 0x111   : > { %v971_v45 = vpop.f32.mrf.mxu3 }
 0x113   : > { %v917_v24 = vpop.f32.mrf.mxu0 }
 0x116   : > { %2524 = vmatmul.msk.f32.gmra.mxu0 %vm836_vm0, %v833_v23 }
 0x11b   : > { %v920_v26 = vpop.f32.mrf.mxu0 }
 0x11e   : > { %2525 = vmatmul.msk.f32.gmra.mxu0 %vm836_vm0, %v834_v25 }
 0x123   : > { %v923_v27 = vpop.f32.mrf.mxu0 }
 0x124   : > { %995 = vmatpush.msra.mxu1 %v923_v27 }
 0x126   : > { %996 = vmatpush.msra.mxu1 %v920_v26 }
 0x128   : > { %997 = vmatpush.msra.mxu1 %v917_v24 }
 0x12a   : > { %998 = vmatpush.msra.mxu1 %v914_v22 }
 0x12b   : > { %v926_v28 = vpop.f32.mrf.mxu0  ;;  %2527 = vmatmul.msk.f32.vlgmr.msra.gmra.mxu1 %vm836_vm0, %v817_v31 }
 0x133   : > { %v929_v29 = vpop.f32.mrf.mxu0  ;;  %2528 = vmatmul.msk.f32.gmra.mxu1 %vm836_vm0, %v818_v33 }
 0x13b   : > { %v932_v30 = vpop.f32.mrf.mxu0  ;;  %2529 = vmatmul.msk.f32.gmra.mxu1 %vm836_vm0, %v819_v35 }
 0x143   : > { %v935_v32 = vpop.f32.mrf.mxu0 }
 0x144   : > { %1021 = vmatpush.msra.mxu2 %v935_v32 }
 0x146   : > { %1022 = vmatpush.msra.mxu2 %v932_v30 }
 0x148   : > { %1023 = vmatpush.msra.mxu2 %v929_v29 }
 0x14a   : > { %1024 = vmatpush.msra.mxu2 %v926_v28 }
 0x14b   : > { %v938_v34 = vpop.f32.mrf.mxu0  ;;  %2530 = vmatmul.msk.f32.vlgmr.msra.gmra.mxu2 %vm836_vm0, %v817_v31 }
 0x14c   : > { %1099 = vmatpush.msrb.mxu2 %v971_v45 }
 0x153   : > { %v941_v36 = vpop.f32.mrf.mxu0  ;;  %2531 = vmatmul.msk.f32.gmra.mxu2 %vm836_vm0, %v818_v33 }
 0x15b   : > { %v944_v37 = vpop.f32.mrf.mxu0  ;;  %2532 = vmatmul.msk.f32.gmra.mxu2 %vm836_vm0, %v819_v35 }
 0x163   : > { %v947_v38 = vpop.f32.mrf.mxu0 }
 0x164   : > { %1047 = vmatpush.msrb.mxu3 %v947_v38 }
 0x166   : > { %1048 = vmatpush.msrb.mxu3 %v944_v37 }
 0x168   : > { %1049 = vmatpush.msrb.mxu3 %v941_v36 }
 0x16a   : > { %1050 = vmatpush.msrb.mxu3 %v938_v34 }
 0x16b   : > { %v950_v40 = vpop.f32.mrf.mxu0  ;;  %2533 = vmatmul.msk.f32.vlgmr.msrb.gmra.mxu3 %vm836_vm0, %v817_v31 }
 0x16c   : > { %1286 = vmatpush.msra.mxu3 %v1273_v39 }
 0x16e   : > { %1287 = vmatpush.msra.mxu3 %v1272_v41 }
 0x170   : > { %1288 = vmatpush.msra.mxu3 %v1271_v42 }
 0x172   : > { %1289 = vmatpush.msra.mxu3 %v1270_v43 }
 0x173   : > { %v953_v44 = vpop.f32.mrf.mxu0  ;;  %2534 = vmatmul.msk.f32.gmra.mxu3 %vm836_vm0, %v818_v33 }
 0x17b   : > { %v956_v46 = vpop.f32.mrf.mxu0  ;;  %2535 = vmatmul.msk.f32.gmra.mxu3 %vm836_vm0, %v819_v35 }
 0x183   : > { %v959_v47 = vpop.f32.mrf.mxu0  ;;  %2542 = vmatmul.msk.f32.vlgmr.msra.gmra.mxu3 %vm836_vm0, %v3700_v4 }
 0x184   : > { %1073 = vmatpush.msrb.mxu1 %v959_v47 }
 0x186   : > { %1074 = vmatpush.msrb.mxu1 %v956_v46 }
 0x188   : > { %1075 = vmatpush.msrb.mxu1 %v953_v44 }
 0x18a   : > { %1076 = vmatpush.msrb.mxu1 %v950_v40 }
 0x18b   : > { %v962_v48 = vpop.f32.mrf.mxu0  ;;  %2536 = vmatmul.msk.f32.vlgmr.msrb.gmra.mxu1 %vm836_vm0, %v817_v31  ;;  %2543 = vmatmul.msk.f32.gmra.mxu3 %vm836_vm0, %v3705_v5 }
 0x18c   : > { %1315 = vmatpush.msra.mxu1 %v1273_v39  ;;  %v3846_v39 = vld [vmem:[#allocation16] sm:$0xff] }
 0x18e   : > { %1316 = vmatpush.msra.mxu1 %v1272_v41 }
 0x190   : > { %1317 = vmatpush.msra.mxu1 %v1271_v42 }
 0x192   : > { %1318 = vmatpush.msra.mxu1 %v1270_v43 }
 0x193   : > { %v965_v49 = vpop.f32.mrf.mxu0  ;;  %2537 = vmatmul.msk.f32.gmra.mxu1 %vm836_vm0, %v818_v33  ;;  %2544 = vmatmul.msk.f32.gmra.mxu3 %vm836_vm0, %v3710_v6 }
 0x19b   : > { %v968_v50 = vpop.f32.mrf.mxu0  ;;  %2538 = vmatmul.msk.f32.gmra.mxu1 %vm836_vm0, %v819_v35  ;;  %2545 = vmatmul.msk.f32.gmra.mxu3 %vm836_vm0, %v3715_v7 }
 0x19c   : > { %1100 = vmatpush.msrb.mxu2 %v968_v50 }
 0x19e   : > { %1101 = vmatpush.msrb.mxu2 %v965_v49 }
 0x1a0   : > { %1102 = vmatpush.msrb.mxu2 %v962_v48 }
 0x1a1   : > { %2539 = vmatmul.msk.f32.vlgmr.msrb.gmra.mxu2 %vm836_vm0, %v817_v31 }
 0x1a3   : > { %2546 = vmatmul.msk.f32.vlgmr.msra.gmra.mxu1 %vm836_vm0, %v3720_v8 }
 0x1a8   : > { %v1000_v51 = vpop.f32.mrf.mxu1 }
 0x1a9   : > { %2540 = vmatmul.msk.f32.gmra.mxu2 %vm836_vm0, %v818_v33  ;;  %v1113_v62 = vmul.f32 %v1000_v51, %v1000_v51 }
 0x1ab   : > { %2547 = vmatmul.msk.f32.gmra.mxu1 %vm836_vm0, %v3725_v9 }
 0x1b0   : > { %v1003_v53 = vpop.f32.mrf.mxu1 }
 0x1b1   : > { %2541 = vmatmul.msk.f32.gmra.mxu2 %vm836_vm0, %v819_v35  ;;  %v1114_v3 = vmul.f32 %v1003_v53, %v1003_v53 }
 0x1b3   : > { %2548 = vmatmul.msk.f32.gmra.mxu1 %vm836_vm0, %v3730_v10 }
 0x1b8   : > { %v3806_v57 = vpop.f32.mrf.mxu1 }
 0x1b9   : > { %v1115_v14 = vmul.f32 %v3806_v57, %v3806_v57 }
 0x1bb   : > { %2549 = vmatmul.msk.f32.gmra.mxu1 %vm836_vm0, %v3735_v11 }
 0x1ce   : > { %v1026_v55 = vpop.f32.mrf.mxu2 }
 0x1cf   : > { %v1116_v59 = vmul.f32 %v1026_v55, %v1026_v55  ;;  %v1119_v29 = vmul.f32 %v1026_v55, %v1000_v51 }
 0x1d1   : > { %v1197_v5 = vadd.f32 %v1116_v59, %v1113_v62  ;;  %v1188_v37 = vmul.f32 2.0, %v1119_v29 }
 0x1d3   : > { %v3810_v13 = vadd.f32 0.0001, %v1197_v5  ;;  %v3854_v47 = vadd.f32 0.0001, %v1188_v37 }
 0x1d5   : > { %v1214_v44 = vand.u32 2147483648, %v3810_v13  ;;  %vm1208_vm1 = vweird.f32 %v3810_v13 }
 0x1d6   : > { %v1029_v60 = vpop.f32.mrf.mxu2 }
 0x1d7   : > { %v1117_v4 = vmul.f32 %v1029_v60, %v1029_v60  ;;  %v3837_v33 = vmul.f32 %v1029_v60, %v1003_v53  ;;  %v1212_v53 = vand.u32 2147483647, %v3810_v13 }
 0x1d9   : > { %v1198_v11 = vadd.f32 %v1117_v4, %v1114_v3  ;;  %v1189_v41 = vmul.f32 2.0, %v3837_v33  ;;  %vm3914_vm11 = vcmp.eq.f32.partialorder %v1212_v53, 8.507059e+37 }
 0x1db   : > { %v3817_v18 = vadd.f32 0.0001, %v1198_v11 }
 0x1dd   : > { %vm1223_vm4 = vweird.f32 %v3817_v18 }
 0x1de   : > { %v1032_v10 = vpop.f32.mrf.mxu2 }
 0x1df   : > { %v1118_v15 = vmul.f32 %v1032_v10, %v1032_v10  ;;  %v3873_v60 = vmul.f32 %v1032_v10, %v3806_v57 }
 0x1e1   : > { %v1199_v20 = vadd.f32 %v1118_v15, %v1115_v14 }
 0x1e3   : > { %v3826_v26 = vadd.f32 0.0001, %v1199_v20 }
 0x1ee   : > { %v1052_v52 = vpop.f32.mrf.mxu3 }
 0x1ef   : > { %v1122_v0 = vsub.f32 %v1052_v52, %v1113_v62  ;;  %v1229_v62 = vand.u32 2147483648, %v3817_v18 }
 0x1f6   : > { %v1055_v54 = vpop.f32.mrf.mxu3 }
 0x1f7   : > { %v1123_v7 = vsub.f32 %v1055_v54, %v1114_v3  ;;  %v3865_v54 = vadd.f32 0.0001, %v1189_v41 }
 0x1fe   : > { %v1058_v56 = vpop.f32.mrf.mxu3 }
 0x1ff   : > { %v1124_v21 = vsub.f32 %v1058_v56, %v1115_v14  ;;  %v3870_v56 = vor.u32 1.1754944e-38, %v1214_v44 }
 0x206   : > { %v1291_v58 = vpop.f32.mrf.mxu3 }
 0x208   : > { %v1078_v61 = vpop.f32.mrf.mxu1 }
 0x209   : > { %v1125_v63 = vsub.f32 %v1078_v61, %v1116_v59  ;;  %v1386_v59 = vld [vmem:[#allocation10 + $0x8] sm:$0xff] }
 0x20b   : > { %v1137_v1 = vadd.f32 %v1125_v63, %v1122_v0 }
 0x20d   : > { %v3808_v8 = vadd.f32 0.0009, %v1137_v1 }
 0x20e   : > { %v1294_v2 = vpop.f32.mrf.mxu3 }
 0x20f   : > { %2818 = vrcp.f32 %v3808_v8  ;;  %vm1148_vm6 = vweird.f32 %v3808_v8  ;;  %v1152_v10 = vand.u32 2147483647, %v3808_v8 }
 0x210   : > { %v1081_v6 = vpop.f32.mrf.mxu1 }
 0x211   : > { %v1126_v9 = vsub.f32 %v1081_v6, %v1117_v4  ;;  %v1154_v4 = vand.u32 2147483648, %v3808_v8  ;;  %vm1153_vm12 = vcmp.eq.f32.partialorder %v1152_v10, 8.507059e+37 }
 0x213   : > { %v1138_v12 = vadd.f32 %v1126_v9, %v1123_v7 }
 0x215   : > { %v3815_v16 = vadd.f32 0.0009, %v1138_v12  ;;  %v3821_v23 = vpop.eup %2818 }
 0x216   : > { %v1297_v17 = vpop.f32.mrf.mxu3  ;;  %v1144_v30 = vmul.f32 %v3821_v23, %v3808_v8  ;;  %vm1149_vm3 = vweird.f32 %v3821_v23  ;;  %v1227_v8 = vand.u32 2147483647, %v3817_v18 }
 0x217   : > { %2820 = vrcp.f32 %v3815_v16  ;;  %v1169_v6 = vand.u32 2147483648, %v3815_v16  ;;  %vm3891_vm7 = vmor %vm1148_vm6, %vm1149_vm3  ;;  %vm1163_vm8 = vweird.f32 %v3815_v16  ;;  %v1167_v12 = vand.u32 2147483647, %v3815_v16 }
 0x218   : > { %2822 = vrcp.f32 %v3810_v13  ;;  %v1084_v19 = vpop.f32.mrf.mxu1  ;;  %v1145_v38 = vsub.f32 1.0, %v1144_v30  ;;  %vm3928_vm15 = vcmp.eq.f32.partialorder %v1227_v8, 8.507059e+37 }
 0x219   : > { %v1127_v22 = vsub.f32 %v1084_v19, %v1118_v15  ;;  %2824 = vrcp.f32 %v3817_v18  ;;  %vm1168_vm13 = vcmp.eq.f32.partialorder %v1167_v12, 8.507059e+37 }
 0x21a   : > { %v1146_v48 = vmul.f32 %v3821_v23, %v1145_v38 }
 0x21b   : > { %v1139_v24 = vadd.f32 %v1127_v22, %v1124_v21 }
 0x21c   : > { %v1147_v63 = vadd.f32 %v3821_v23, %v1146_v48 }
 0x21d   : > { %v3824_v25 = vpop.eup %2820  ;;  %v3828_v27 = vadd.f32 0.0009, %v1139_v24  ;;  %v1170_v24 = vor.u32 1.1754944e-38, %v1169_v6 }
 0x21e   : > { %v3830_v28 = vpop.eup %2822  ;;  %v1300_v31 = vpop.f32.mrf.mxu3  ;;  %v1159_v32 = vmul.f32 %v3824_v25, %v3815_v16  ;;  %vm1164_vm5 = vweird.f32 %v3824_v25  ;;  %v1151_v14 = vsel %vm3891_vm7, %v3821_v23, %v1147_v63  ;;  %v1155_v23 = vor.u32 1.1754944e-38, %v1154_v4 }
 0x21f   : > { %2826 = vrcp.f32 %v3828_v27  ;;  %1350 = vmatpush.msra.mxu2 %v1300_v31  ;;  %v3841_v35 = vpop.eup %2824  ;;  %v1204_v36 = vmul.f32 %v3830_v28, %v3810_v13  ;;  %vm1209_vm2 = vweird.f32 %v3830_v28  ;;  %vm3902_vm9 = vmor %vm1163_vm8, %vm1164_vm5  ;;  %v1230_v31 = vor.u32 1.1754944e-38, %v1229_v62 }
 0x220   : > { %v3839_v34 = vpop.f32.mrf.mxu1  ;;  %2828 = vrcp.f32 %v3826_v26  ;;  %v1160_v40 = vsub.f32 1.0, %v1159_v32  ;;  %v1219_v42 = vmul.f32 %v3841_v35, %v3817_v18  ;;  %vm1224_vm10 = vweird.f32 %v3841_v35  ;;  %v1636_v18 = vld [vmem:[%s4180_s22 + $0x8] sm:$0xff] }
 0x221   : > { %1351 = vmatpush.msra.mxu2 %v1297_v17  ;;  %v1205_v46 = vsub.f32 1.0, %v1204_v36  ;;  %vm3924_vm14 = vmor %vm1223_vm4, %vm1224_vm10  ;;  %v1156_v36 = vsel %vm1153_vm12, %v1155_v23, %v1151_v14  ;;  %vm1238_vm5 = vweird.f32 %v3826_v26  ;;  %v1182_v13 = vand.u32 2147483647, %v3828_v27 }
 0x222   : > { %v1161_v52 = vmul.f32 %v3824_v25, %v1160_v40  ;;  %vm3939_vm4 = vmor %vm1208_vm1, %vm1209_vm2  ;;  %vm1178_vm1 = vweird.f32 %v3828_v27  ;;  %vm1249_vm10 = vcmask 179200   ;;  %vm1253_vm12 = vcmask 177152  }
 0x223   : > { %1352 = vmatpush.msra.mxu2 %v1294_v2  ;;  %v1206_v61 = vmul.f32 %v3830_v28, %v1205_v46  ;;  %v3885_v2 = vld [vmem:[#allocation16 + $0x8] sm:$0xff]  ;;  %v1184_v46 = vand.u32 2147483648, %v3828_v27  ;;  %vm1183_vm8 = vcmp.eq.f32.partialorder %v1182_v13, 8.507059e+37 }
 0x224   : > { %v1104_v43 = vpop.f32.mrf.mxu2  ;;  %v1162_v57 = vadd.f32 %v3824_v25, %v1161_v52  ;;  %v1190_v52 = vmul.f32 2.0, %v3873_v60 }
 0x225   : > { %v3852_v45 = vpop.eup %2826  ;;  %1353 = vmatpush.msra.mxu2 %v1291_v58  ;;  %v1128_v51 = vsub.f32 %v1104_v43, %v1119_v29  ;;  %v1220_v58 = vsub.f32 1.0, %v1219_v42  ;;  %v1185_v62 = vor.u32 1.1754944e-38, %v1184_v46 }
 0x226   : > { %2550 = vmatmul.msk.f32.vlgmr.msra.gmra.mxu2 %vm836_vm0, %v3846_v39  ;;  %v3859_v49 = vpop.eup %2828  ;;  %v1174_v50 = vmul.f32 %v3852_v45, %v3828_v27  ;;  %v1166_v16 = vsel %vm3902_vm9, %v3824_v25, %v1162_v57  ;;  %vm1179_vm3 = vweird.f32 %v3852_v45 }
 0x227   : > { %1438 = vmatpush.msrb.mxu2 %v1386_v59  ;;  %v1234_v0 = vmul.f32 %v3859_v49, %v3826_v26  ;;  %v1131_v1 = vmul.f32 2.0, %v1128_v51  ;;  %v1221_v7 = vmul.f32 %v3841_v35, %v1220_v58  ;;  %v1171_v37 = vsel %vm1168_vm13, %v1170_v24, %v1166_v16  ;;  %vm3954_vm2 = vmor %vm1178_vm1, %vm1179_vm3 }
 0x228   : > { %v3867_v55 = vpop.f32.mrf.mxu1  ;;  %v1175_v3 = vsub.f32 1.0, %v1174_v50  ;;  %vm1239_vm6 = vweird.f32 %v3859_v49  ;;  %v1242_v58 = vand.u32 2147483647, %v3826_v26  ;;  %vm1620_vm1 = vcmask 46080  }
 0x229   : > { %v1235_v17 = vsub.f32 1.0, %v1234_v0  ;;  %v1134_v19 = vadd.f32 0.0009, %v1131_v1  ;;  %v1222_v30 = vadd.f32 %v3841_v35, %v1221_v7  ;;  %vm3974_vm7 = vmor %vm1238_vm5, %vm1239_vm6 }
 0x22a   : > { %v1176_v21 = vmul.f32 %v3852_v45, %v1175_v3  ;;  %vm1243_vm9 = vcmp.eq.f32.partialorder %v1242_v58, 8.507059e+37 }
 0x22b   : > { %v1236_v40 = vmul.f32 %v3859_v49, %v1235_v17  ;;  %v1157_v41 = vmul.f32 %v1156_v36, %v1134_v19  ;;  %v1226_v48 = vsel %vm3924_vm14, %v3841_v35, %v1222_v30  ;;  %v1384_v36 = vld [vmem:[#allocation9] sm:$0x3f] }
 0x22c   : > { %v1107_v5 = vpop.f32.mrf.mxu2  ;;  %v1177_v43 = vadd.f32 %v3852_v45, %v1176_v21  ;;  %v1231_v0 = vsel %vm3928_vm15, %v1230_v31, %v1226_v48 }
 0x22d   : > { %v1129_v11 = vsub.f32 %v1107_v5, %v3837_v33  ;;  %v1207_v33 = vadd.f32 %v3830_v28, %v1206_v61  ;;  %v1194_v59 = vmul.f32 %v3854_v47, %v1157_v41 }
 0x22e   : > { %2551 = vmatmul.msk.f32.gmra.mxu2 %vm836_vm0, %v3885_v2  ;;  %v1181_v27 = vsel %vm3954_vm2, %v3852_v45, %v1177_v43  ;;  %v1193_v45 = vadd.f32 0.0001, %v1190_v52  ;;  %vm1728_vm2 = vcmask 64512  }
 0x22f   : > { %v1132_v20 = vmul.f32 2.0, %v1129_v11  ;;  %v1211_v35 = vsel %vm3939_vm4, %v3830_v28, %v1207_v33  ;;  %v1186_v57 = vsel %vm1183_vm8, %v1185_v62, %v1181_v27 }
 0x230   : > { %v1326_v29 = vpop.f32.mrf.mxu1  ;;  %v1216_v3 = vsel %vm3914_vm11, %v3870_v56, %v1211_v35  ;;  %vm1393_vm11 = vcmask 130048  }
 0x231   : > { %v1135_v32 = vadd.f32 0.0009, %v1132_v20  ;;  %v1217_v6 = vmul.f32 %v1216_v3, %v1194_v59  ;;  %v1634_v3 = vld [vmem:[#allocation19] sm:$0xff] }
 0x233   : > { %v1172_v42 = vmul.f32 %v1171_v37, %v1135_v32  ;;  %v1250_v56 = vsel %vm1249_vm10, %v1217_v6, 0.0 }
 0x234   : > { %v1110_v44 = vpop.f32.mrf.mxu2 }
 0x235   : > { %v1195_v50 = vmul.f32 %v3865_v54, %v1172_v42  ;;  %v1130_v51 = vsub.f32 %v1110_v44, %v3873_v60  ;;  %v1244_v54 = vand.u32 2147483648, %v3826_v26  ;;  %v1237_v60 = vadd.f32 %v3859_v49, %v1236_v40  ;;  %v1635_v44 = vld [vmem:[%s4180_s22] sm:$0xff] }
 0x237   : > { %v1133_v61 = vmul.f32 2.0, %v1130_v51  ;;  %v1232_v1 = vmul.f32 %v1231_v0, %v1195_v50  ;;  %v1245_v4 = vor.u32 1.1754944e-38, %v1244_v54  ;;  %v1241_v26 = vsel %vm3974_vm7, %v3859_v49, %v1237_v60  ;;  %v1385_v49 = vld [vmem:[#allocation10] sm:$0xff] }
 0x238   : > { %v1329_v63 = vpop.f32.mrf.mxu1  ;;  %1439 = vmatpush.msrb.mxu2 %v1385_v49 }
 0x239   : > { %v1136_v47 = vadd.f32 0.0009, %v1133_v61  ;;  %1373 = vmatpush.msrb.mxu3 %v1329_v63  ;;  %v1251_v9 = vsel %vm1249_vm10, %v1232_v1, 0.0  ;;  %v1246_v10 = vsel %vm1243_vm9, %v1245_v4, %v1241_v26 }
 0x23a   : > { %v1252_v12 = vadd.f32 %v1251_v9, %v1250_v56 }
 0x23b   : > { %v1187_v5 = vmul.f32 %v1186_v57, %v1136_v47  ;;  %1374 = vmatpush.msrb.mxu3 %v1326_v29 }
 0x23d   : > { %1375 = vmatpush.msrb.mxu3 %v3867_v55  ;;  %v1196_v7 = vmul.f32 %v1193_v45, %v1187_v5 }
 0x23f   : > { %1376 = vmatpush.msrb.mxu3 %v3839_v34  ;;  %v1247_v11 = vmul.f32 %v1246_v10, %v1196_v7 }
 0x240   : > { %2552 = vmatmul.msk.f32.vlgmr.msrb.gmra.mxu3 %vm836_vm0, %v3846_v39 }
 0x241   : > { %v1254_v14 = vsel %vm1253_vm12, %v1247_v11, 0.0 }
 0x242   : > { %v1255_v15 = vadd.f32 %v1254_v14, %v1252_v12 }
 0x244   : > { %1256 = vadd.xlane.f32.xlu0 %v1255_v15 }
 0x248   : > { %2553 = vmatmul.msk.f32.gmra.mxu3 %vm836_vm0, %v3885_v2 }
 0x2a9   : > { %v1355_v55 = vpop.f32.mrf.mxu2 }
 0x2aa   : > { %2554 = vmatmul.msk.f32.vlgmr.msrb.gmra.mxu2 %vm1393_vm11, %v1355_v55  ;;  %v1387_v23 = vmul.f32 %v1355_v55, %v1355_v55 }
 0x2b1   : > { %v1358_v8 = vpop.f32.mrf.mxu2 }
 0x2b2   : > { %2555 = vmatmul.msk.f32.gmra.mxu2 %vm1393_vm11, %v1358_v8  ;;  %v1388_v24 = vmul.f32 %v1358_v8, %v1358_v8 }
 0x2b7   : > { %v1257_v34 = vpop.xlane.xlu0 %1256 }
 0x2b8   : > { %v1258_v17 = vrot.slane %v1257_v34, 4 }
 0x2ba   : > { %v1259_v19 = vadd.f32 %v1258_v17, %v1257_v34 }
 0x2bc   : > { %v1260_v39 = vrot.slane %v1259_v19, 2 }
 0x2be   : > { %v1261_v20 = vadd.f32 %v1260_v39, %v1259_v19 }
 0x2c0   : > { %v1262_v16 = vrot.slane %v1261_v20, 1 }
 0x2c2   : > { %v1263_v21 = vadd.f32 %v1262_v16, %v1261_v20 }
 0x2c3   : > { %v1378_v22 = vpop.f32.mrf.mxu3 }
 0x2c4   : > { %2595 = vpush %v1263_v21  ;;  %2556 = vmatmul.msk.f32.gmra.mxu2 %vm1393_vm11, %v1378_v22  ;;  %v1389_v29 = vmul.f32 %v1378_v22, %v1378_v22  ;;  %v1391_v31 = vmul.f32 %v1378_v22, %v1355_v55 }
 0x2cb   : > { %v1381_v2 = vpop.f32.mrf.mxu3 }
 0x2cc   : > { %2557 = vmatmul.msk.f32.gmra.mxu2 %vm1393_vm11, %v1381_v2  ;;  %v1390_v30 = vmul.f32 %v1381_v2, %v1381_v2  ;;  %v1392_v32 = vmul.f32 %v1381_v2, %v1358_v8 }
 0x2d4   : > { %2558 = vmatmul.msk.f32.gmra.mxu2 %vm1393_vm11, %v1387_v23 }
 0x2dc   : > { %2559 = vmatmul.msk.f32.gmra.mxu2 %vm1393_vm11, %v1388_v24 }
 0x2e4   : > { %2560 = vmatmul.msk.f32.gmra.mxu2 %vm1393_vm11, %v1389_v29 }
 0x2ec   : > { %2561 = vmatmul.msk.f32.gmra.mxu2 %vm1393_vm11, %v1390_v30  ;;  %v1840_v30 = vld [vmem:[#allocation22] sm:$0xff] }
 0x2f4   : > { %2562 = vmatmul.msk.f32.gmra.mxu2 %vm1393_vm11, %v1391_v31  ;;  %v1726_v31 = vld [vmem:[#allocation12] sm:$0xff] }
 0x2f5   : > { %s4026_s0 = spop %2595 }
 0x2fc   : > { %2563 = vmatmul.msk.f32.gmra.mxu2 %vm1393_vm11, %v1392_v32 }
 0x32d   : > { %v1441_v33 = vpop.f32.mrf.mxu2 }
 0x335   : > { %v1444_v25 = vpop.f32.mrf.mxu2 }
 0x336   : > { %1488 = vmatpush.msra.mxu3 %v1444_v25 }
 0x338   : > { %1489 = vmatpush.msra.mxu3 %v1441_v33 }
 0x339   : > { %2564 = vmatmul.msk.f32.vlgmr.msra.gmra.mxu3 %vm1393_vm11, %v1384_v36 }
 0x347   : > { %v1447_v37 = vpop.f32.mrf.mxu2 }
 0x34f   : > { %v1450_v38 = vpop.f32.mrf.mxu2 }
 0x350   : > { %1508 = vmatpush.msrb.mxu1 %v1450_v38 }
 0x352   : > { %1509 = vmatpush.msrb.mxu1 %v1447_v37 }
 0x353   : > { %2565 = vmatmul.msk.f32.vlgmr.msrb.gmra.mxu1 %vm1393_vm11, %v1384_v36 }
 0x357   : > { %v1453_v40 = vpop.f32.mrf.mxu2 }
 0x35f   : > { %v1456_v41 = vpop.f32.mrf.mxu2 }
 0x360   : > { %1528 = vmatpush.msrb.mxu3 %v1456_v41 }
 0x362   : > { %1529 = vmatpush.msrb.mxu3 %v1453_v40 }
 0x363   : > { %2566 = vmatmul.msk.f32.vlgmr.msrb.gmra.mxu3 %vm1393_vm11, %v1384_v36 }
 0x367   : > { %v1459_v42 = vpop.f32.mrf.mxu2 }
 0x36f   : > { %v1462_v43 = vpop.f32.mrf.mxu2 }
 0x370   : > { %1548 = vmatpush.msra.mxu1 %v1462_v43 }
 0x372   : > { %1549 = vmatpush.msra.mxu1 %v1459_v42 }
 0x373   : > { %2567 = vmatmul.msk.f32.vlgmr.msra.gmra.mxu1 %vm1393_vm11, %v1384_v36 }
 0x374   : > { %1651 = vmatpush.msrb.mxu1 %v1636_v18 }
 0x376   : > { %1652 = vmatpush.msrb.mxu1 %v1635_v44 }
 0x377   : > { %v1465_v46 = vpop.f32.mrf.mxu2 }
 0x37b   : > { %2569 = vmatmul.msk.f32.vlgmr.msrb.gmra.mxu1 %vm1393_vm11, %v1355_v55 }
 0x37f   : > { %v1468_v48 = vpop.f32.mrf.mxu2 }
 0x380   : > { %1568 = vmatpush.msra.mxu3 %v1468_v48 }
 0x382   : > { %1569 = vmatpush.msra.mxu3 %v1465_v46 }
 0x383   : > { %2568 = vmatmul.msk.f32.vlgmr.msra.gmra.mxu3 %vm1393_vm11, %v1384_v36  ;;  %2570 = vmatmul.msk.f32.gmra.mxu1 %vm1393_vm11, %v1358_v8 }
 0x384   : > { %1674 = vmatpush.msrb.mxu3 %v1636_v18 }
 0x386   : > { %1675 = vmatpush.msrb.mxu3 %v1635_v44 }
 0x38b   : > { %2571 = vmatmul.msk.f32.vlgmr.msrb.gmra.mxu3 %vm1393_vm11, %v1378_v22 }
 0x393   : > { %2572 = vmatmul.msk.f32.gmra.mxu3 %vm1393_vm11, %v1381_v2 }
 0x3bc   : > { %v1491_v50 = vpop.f32.mrf.mxu3 }
 0x3bd   : > { %v1574_v13 = vmul.f32 %v1491_v50, %v1491_v50 }
 0x3d0   : > { %v1511_v51 = vpop.f32.mrf.mxu1 }
 0x3d1   : > { %v1575_v52 = vmul.f32 %v1511_v51, %v1511_v51  ;;  %v1576_v5 = vmul.f32 %v1511_v51, %v1491_v50 }
 0x3d3   : > { %v1602_v53 = vadd.f32 %v1575_v52, %v1574_v13  ;;  %v1599_v56 = vmul.f32 2.0, %v1576_v5 }
 0x3d5   : > { %v1603_v54 = vadd.f32 0.0001, %v1602_v53  ;;  %v1600_v39 = vadd.f32 0.0001, %v1599_v56 }
 0x3d7   : > { %2830 = vrcp.f32 %v1603_v54  ;;  %vm1609_vm14 = vweird.f32 %v1603_v54  ;;  %v1615_v12 = vand.u32 2147483648, %v1603_v54  ;;  %v1613_v55 = vand.u32 2147483647, %v1603_v54 }
 0x3d9   : > { %v1616_v19 = vor.u32 1.1754944e-38, %v1615_v12  ;;  %vm1614_vm6 = vcmp.eq.f32.partialorder %v1613_v55, 8.507059e+37 }
 0x3dd   : > { %v2831_v63 = vpop.eup %2830 }
 0x3de   : > { %v1605_v28 = vmul.f32 %v2831_v63, %v1603_v54  ;;  %vm1610_vm15 = vweird.f32 %v2831_v63 }
 0x3df   : > { %vm1611_vm4 = vmor %vm1609_vm14, %vm1610_vm15  ;;  %vm1932_vm14 = vcmask 27648   ;;  %vm2049_vm15 = vcmask 1043456  }
 0x3e0   : > { %v1606_v57 = vsub.f32 1.0, %v1605_v28 }
 0x3e2   : > { %v1607_v26 = vmul.f32 %v2831_v63, %v1606_v57 }
 0x3e4   : > { %v1608_v49 = vadd.f32 %v2831_v63, %v1607_v26 }
 0x3e6   : > { %v1531_v35 = vpop.f32.mrf.mxu3  ;;  %v1612_v16 = vsel %vm1611_vm4, %v2831_v63, %v1608_v49 }
 0x3e7   : > { %v1577_v58 = vsub.f32 %v1531_v35, %v1574_v13  ;;  %v1617_v2 = vsel %vm1614_vm6, %v1616_v19, %v1612_v16 }
 0x3f0   : > { %v1551_v59 = vpop.f32.mrf.mxu1 }
 0x3f1   : > { %v1578_v61 = vsub.f32 %v1551_v59, %v1575_v52 }
 0x3f3   : > { %v1582_v27 = vadd.f32 %v1578_v61, %v1577_v58 }
 0x3f5   : > { %v1583_v60 = vadd.f32 0.0009, %v1582_v27 }
 0x3f7   : > { %2832 = vrcp.f32 %v1583_v60  ;;  %vm1589_vm0 = vweird.f32 %v1583_v60  ;;  %v1595_v9 = vand.u32 2147483648, %v1583_v60  ;;  %v1593_v11 = vand.u32 2147483647, %v1583_v60 }
 0x3f8   : > { %v1654_v62 = vpop.f32.mrf.mxu1 }
 0x3f9   : > { %v1596_v8 = vor.u32 1.1754944e-38, %v1595_v9  ;;  %vm1594_vm5 = vcmp.eq.f32.partialorder %v1593_v11, 8.507059e+37 }
 0x3fd   : > { %v2833_v0 = vpop.eup %2832 }
 0x3fe   : > { %v1585_v47 = vmul.f32 %v2833_v0, %v1583_v60  ;;  %vm1590_vm13 = vweird.f32 %v2833_v0 }
 0x3ff   : > { %vm1591_vm3 = vmor %vm1589_vm0, %vm1590_vm13 }
 0x400   : > { %v1657_v1 = vpop.f32.mrf.mxu1  ;;  %v1586_v45 = vsub.f32 1.0, %v1585_v47  ;;  %v1839_v47 = vld [vmem:[#allocation21] sm:$0xf] }
 0x401   : > { %1700 = vmatpush.msra.mxu1 %v1657_v1 }
 0x402   : > { %v1587_v4 = vmul.f32 %v2833_v0, %v1586_v45 }
 0x403   : > { %1701 = vmatpush.msra.mxu1 %v1654_v62 }
 0x404   : > { %2573 = vmatmul.msk.f32.vlgmr.msra.gmra.mxu1 %vm1393_vm11, %v1634_v3  ;;  %v1588_v6 = vadd.f32 %v2833_v0, %v1587_v4 }
 0x405   : > { %1859 = vmatpush.msrb.mxu1 %v1840_v30 }
 0x406   : > { %v1571_v7 = vpop.f32.mrf.mxu3  ;;  %v1592_v15 = vsel %vm1591_vm3, %v2833_v0, %v1588_v6  ;;  %vm2045_vm3 = vcmask 31744  }
 0x407   : > { %v1579_v10 = vsub.f32 %v1571_v7, %v1576_v5  ;;  %v1597_v17 = vsel %vm1594_vm5, %v1596_v8, %v1592_v15 }
 0x409   : > { %v1580_v14 = vmul.f32 2.0, %v1579_v10 }
 0x40b   : > { %v1581_v34 = vadd.f32 0.0009, %v1580_v14 }
 0x40d   : > { %v1598_v20 = vmul.f32 %v1597_v17, %v1581_v34 }
 0x40e   : > { %v1677_v21 = vpop.f32.mrf.mxu3 }
 0x40f   : > { %v1601_v22 = vmul.f32 %v1600_v39, %v1598_v20 }
 0x411   : > { %v1618_v23 = vmul.f32 %v1617_v2, %v1601_v22 }
 0x413   : > { %v1621_v24 = vsel %vm1620_vm1, %v1618_v23, 0.0 }
 0x414   : > { %1622 = vadd.xlane.f32.xlu0 %v1621_v24 }
 0x416   : > { %v1680_v29 = vpop.f32.mrf.mxu3 }
 0x417   : > { %1720 = vmatpush.msra.mxu3 %v1680_v29 }
 0x419   : > { %1721 = vmatpush.msra.mxu3 %v1677_v21 }
 0x41a   : > { %2574 = vmatmul.msk.f32.vlgmr.msra.gmra.mxu3 %vm1393_vm11, %v1634_v3 }
 0x41b   : > { %1882 = vmatpush.msrb.mxu3 %v1840_v30 }
 0x481   : > { %v1703_v32 = vpop.f32.mrf.mxu1 }
 0x482   : > { %v1727_v33 = vmul.f32 %v1726_v31, %v1703_v32  ;;  %v1750_v25 = vmul.f32 %v1703_v32, %v1703_v32  ;;  %2575 = vmatmul.msk.f32.vlgmr.msrb.gmra.mxu1 %vm1728_vm2, %v1703_v32 }
 0x484   : > { %v1729_v36 = vsel %vm1728_vm2, %v1727_v33, 0.0  ;;  %v1751_v37 = vmul.f32 %v1750_v25, %v1726_v31 }
 0x485   : > { %1730 = vadd.xlane.f32.xlu1 %v1729_v36 }
 0x486   : > { %v1752_v38 = vsel %vm1728_vm2, %v1751_v37, 0.0 }
 0x487   : > { %v1623_v40 = vpop.xlane.xlu0 %1622  ;;  %1753 = vadd.xlane.f32.xlu2 %v1752_v38 }
 0x488   : > { %v1624_v41 = vrot.slane %v1623_v40, 4 }
 0x48a   : > { %v1625_v42 = vadd.f32 %v1624_v41, %v1623_v40 }
 0x48c   : > { %v1626_v43 = vrot.slane %v1625_v42, 2 }
 0x48e   : > { %v1627_v18 = vadd.f32 %v1626_v43, %v1625_v42 }
 0x490   : > { %v1628_v44 = vrot.slane %v1627_v18, 1 }
 0x492   : > { %v1629_v46 = vadd.f32 %v1628_v44, %v1627_v18 }
 0x494   : > { %2597 = vpush %v1629_v46 }
 0x49d   : > { %v1723_v48 = vpop.f32.mrf.mxu3 }
 0x49e   : > { %2576 = vmatmul.msk.f32.vlgmr.msrb.gmra.mxu3 %vm1728_vm2, %v1723_v48  ;;  %v1739_v50 = vmul.f32 %v1726_v31, %v1723_v48  ;;  %v1762_v51 = vmul.f32 %v1723_v48, %v1723_v48  ;;  %v1774_v13 = vmul.f32 %v1723_v48, %v1703_v32 }
 0x4a0   : > { %v1740_v52 = vsel %vm1728_vm2, %v1739_v50, 0.0  ;;  %v1763_v53 = vmul.f32 %v1762_v51, %v1726_v31  ;;  %v1775_v35 = vmul.f32 %v1774_v13, %v1726_v31 }
 0x4a1   : > { %1741 = vadd.xlane.f32.xlu1 %v1740_v52 }
 0x4a2   : > { %v1764_v58 = vsel %vm1728_vm2, %v1763_v53, 0.0  ;;  %v1776_v54 = vsel %vm1728_vm2, %v1775_v35, 0.0  ;;  %v1930_v35 = vld [vmem:[#allocation13] sm:$0xf] }
 0x4a3   : > { %1765 = vadd.xlane.f32.xlu2 %v1764_v58  ;;  %1777 = vadd.xlane.f32.xlu0 %v1776_v54 }
 0x4c5   : > { %s4028_s20 = spop %2597 }
 0x4f8   : > { %v1731_v59 = vpop.xlane.xlu1 %1730 }
 0x4f9   : > { %v1732_v61 = vrot.slane %v1731_v59, 4 }
 0x4fa   : > { %v1754_v1 = vpop.xlane.xlu2 %1753 }
 0x4fb   : > { %v1733_v27 = vadd.f32 %v1732_v61, %v1731_v59  ;;  %v1755_v45 = vrot.slane %v1754_v1, 4  ;;  %v2044_v59 = vld [vmem:[%s4181_s21] sm:$0xf] }
 0x4fd   : > { %v1734_v60 = vrot.slane %v1733_v27, 2  ;;  %v1756_v57 = vadd.f32 %v1755_v45, %v1754_v1 }
 0x4ff   : > { %v1735_v62 = vadd.f32 %v1734_v60, %v1733_v27  ;;  %v1861_v0 = vpop.f32.mrf.mxu1  ;;  %v1757_v3 = vrot.slane %v1756_v57, 2 }
 0x500   : > { %1905 = vmatpush.msra.mxu1 %v1861_v0 }
 0x501   : > { %v1736_v63 = vrot.slane %v1735_v62, 1  ;;  %2577 = vmatmul.msk.f32.vlgmr.msra.gmra.mxu1 %vm1728_vm2, %v1839_v47  ;;  %v1758_v7 = vadd.f32 %v1757_v3, %v1756_v57 }
 0x502   : > { %2579 = vmatpush.msk.msrb.mxu1 %vm2049_vm15, %v2044_v59 }
 0x503   : > { %v1737_v28 = vadd.f32 %v1736_v63, %v1735_v62  ;;  %v1759_v15 = vrot.slane %v1758_v7, 1 }
 0x505   : > { %2599 = vpush %v1737_v28  ;;  %v1760_v39 = vadd.f32 %v1759_v15, %v1758_v7 }
 0x514   : > { %v1742_v4 = vpop.xlane.xlu1 %1741 }
 0x515   : > { %v1743_v5 = vrot.slane %v1742_v4, 4 }
 0x516   : > { %v1766_v6 = vpop.xlane.xlu2 %1765  ;;  %v1778_v26 = vpop.xlane.xlu0 %1777 }
 0x517   : > { %v1744_v9 = vadd.f32 %v1743_v5, %v1742_v4  ;;  %v1767_v10 = vrot.slane %v1766_v6, 4  ;;  %v1779_v11 = vrot.slane %v1778_v26, 4 }
 0x519   : > { %v1745_v56 = vrot.slane %v1744_v9, 2  ;;  %v1768_v12 = vadd.f32 %v1767_v10, %v1766_v6  ;;  %v1780_v14 = vadd.f32 %v1779_v11, %v1778_v26  ;;  %v2043_v10 = vld [vmem:[#allocation24] sm:$0x3] }
 0x51b   : > { %v1769_v49 = vrot.slane %v1768_v12, 2  ;;  %v1781_v55 = vrot.slane %v1780_v14, 2  ;;  %v1746_v8 = vadd.f32 %v1745_v56, %v1744_v9 }
 0x51d   : > { %v1747_v34 = vrot.slane %v1746_v8, 1  ;;  %v1770_v17 = vadd.f32 %v1769_v49, %v1768_v12  ;;  %v1782_v19 = vadd.f32 %v1781_v55, %v1780_v14 }
 0x51f   : > { %v1748_v20 = vadd.f32 %v1747_v34, %v1746_v8  ;;  %v1771_v16 = vrot.slane %v1770_v17, 1  ;;  %v1783_v21 = vrot.slane %v1782_v19, 1 }
 0x521   : > { %2601 = vpush %v1748_v20  ;;  %v1884_v22 = vpop.f32.mrf.mxu3  ;;  %v1772_v2 = vadd.f32 %v1771_v16, %v1770_v17  ;;  %v1784_v23 = vadd.f32 %v1783_v21, %v1782_v19 }
 0x522   : > { %1925 = vmatpush.msra.mxu3 %v1884_v22  ;;  %2603 = vpush %v1760_v39 }
 0x523   : > { %2605 = vpush %v1772_v2  ;;  %2578 = vmatmul.msk.f32.vlgmr.msra.gmra.mxu3 %vm1728_vm2, %v1839_v47 }
 0x524   : > { %2607 = vpush %v1784_v23  ;;  %2581 = vmatpush.msk.msrb.mxu3 %vm2049_vm15, %v2044_v59 }
 0x536   : > { %s2600_s2 = spop %2599 }
 0x537   : > { %s1786_s16 = smul.f32 %s2600_s2, %s2600_s2 }
 0x552   : > { %s2602_s9 = spop %2601 }
 0x553   : > { %s1787_s1 = smul.f32 %s2602_s9, %s2602_s9  ;;  %s2604_s7 = spop %2603 }
 0x554   : > { %s4030_s17 = smul.f32 %s2602_s9, %s2600_s2  ;;  %s1789_s8 = ssub.f32 %s2604_s7, %s1786_s16 }
 0x555   : > { %s1816_s27 = sadd.f32 %s1787_s1, %s1786_s16  ;;  %s2606_s29 = spop %2605 }
 0x556   : > { %s1790_s24 = ssub.f32 %s2606_s29, %s1787_s1  ;;  %s2608_s4 = spop %2607 }
 0x557   : > { %s1817_s11 = sadd.f32 0.0001, %s1816_s27  ;;  %s1813_s16 = smul.f32 2.0, %s4030_s17 }
 0x558   : > { %s1794_s10 = sadd.f32 %s1790_s24, %s1789_s8 }
 0x559   : > { %v1818_v24 = vstv %s1817_s11  ;;  %s1791_s23 = ssub.f32 %s2608_s4, %s4030_s17 }
 0x55a   : > { %2834 = vrcp.f32 %v1818_v24  ;;  %s1795_s3 = sadd.f32 0.0009, %s1794_s10  ;;  %v1830_v43 = vand.u32 2147483648, %v1818_v24  ;;  %vm1824_vm9 = vweird.f32 %v1818_v24  ;;  %v1828_v18 = vand.u32 2147483647, %v1818_v24 }
 0x55b   : > { %s1792_s2 = smul.f32 2.0, %s1791_s23  ;;  %s4042_s7 = sadd.f32 0.0001, %s1813_s16 }
 0x55c   : > { %v1796_v29 = vstv %s1795_s3  ;;  %v1831_v51 = vor.u32 1.1754944e-38, %v1830_v43  ;;  %vm1829_vm13 = vcmp.eq.f32.partialorder %v1828_v18, 8.507059e+37 }
 0x55d   : > { %2836 = vrcp.f32 %v1796_v29  ;;  %v1808_v38 = vand.u32 2147483648, %v1796_v29  ;;  %v1806_v42 = vand.u32 2147483647, %v1796_v29  ;;  %vm1802_vm10 = vweird.f32 %v1796_v29  ;;  %s1793_s9 = sadd.f32 0.0009, %s1792_s2 }
 0x55f   : > { %v1809_v46 = vor.u32 1.1754944e-38, %v1808_v38  ;;  %vm1807_vm0 = vcmp.eq.f32.partialorder %v1806_v42, 8.507059e+37 }
 0x560   : > { %v2835_v30 = vpop.eup %2834 }
 0x561   : > { %v1820_v31 = vmul.f32 %v2835_v30, %v1818_v24  ;;  %vm1825_vm7 = vweird.f32 %v2835_v30 }
 0x562   : > { %vm1826_vm12 = vmor %vm1824_vm9, %vm1825_vm7 }
 0x563   : > { %v1821_v32 = vsub.f32 1.0, %v1820_v31  ;;  %v2837_v33 = vpop.eup %2836 }
 0x564   : > { %v1798_v25 = vmul.f32 %v2837_v33, %v1796_v29  ;;  %vm1803_vm8 = vweird.f32 %v2837_v33 }
 0x565   : > { %v1822_v36 = vmul.f32 %v2835_v30, %v1821_v32  ;;  %vm1804_vm11 = vmor %vm1802_vm10, %vm1803_vm8  ;;  %vm2147_vm10 = vcmask 9216  }
 0x566   : > { %v1799_v37 = vsub.f32 1.0, %v1798_v25 }
 0x567   : > { %v1823_v40 = vadd.f32 %v2835_v30, %v1822_v36 }
 0x568   : > { %v1800_v41 = vmul.f32 %v2837_v33, %v1799_v37 }
 0x569   : > { %v1827_v48 = vsel %vm1826_vm12, %v2835_v30, %v1823_v40 }
 0x56a   : > { %v1801_v44 = vadd.f32 %v2837_v33, %v1800_v41  ;;  %v1832_v52 = vsel %vm1829_vm13, %v1831_v51, %v1827_v48 }
 0x56c   : > { %v1805_v50 = vsel %vm1804_vm11, %v2837_v33, %v1801_v44 }
 0x56d   : > { %v1810_v13 = vsel %vm1807_vm0, %v1809_v46, %v1805_v50 }
 0x56e   : > { %2609 = vpush %v1810_v13 }
 0x56f   : > { %2611 = vpush %v1832_v52 }
 0x57e   : > { %v1907_v53 = vpop.f32.mrf.mxu1 }
 0x57f   : > { %v1931_v58 = vmul.f32 %v1930_v35, %v1907_v53  ;;  %2580 = vmatmul.msk.f32.vlgmr.msrb.gmra.mxu1 %vm2045_vm3, %v1907_v53  ;;  %v1954_v61 = vmul.f32 %v1907_v53, %v1907_v53 }
 0x581   : > { %v1933_v54 = vsel %vm1932_vm14, %v1931_v58, 0.0  ;;  %v1955_v27 = vmul.f32 %v1954_v61, %v1930_v35 }
 0x582   : > { %1934 = vadd.xlane.f32.xlu1 %v1933_v54 }
 0x583   : > { %v1956_v60 = vsel %vm1932_vm14, %v1955_v27, 0.0 }
 0x584   : > { %1957 = vadd.xlane.f32.xlu0 %v1956_v60 }
 0x59f   : > { %s2610_s1 = spop %2609 }
 0x5a0   : > { %s4044_s8 = smul.f32 %s2610_s1, %s1793_s9  ;;  %s4056_s17 = spop %2611 }
 0x5a2   : > { %s1815_s27 = smul.f32 %s4042_s7, %s4044_s8 }
 0x5a6   : > { %v1927_v62 = vpop.f32.mrf.mxu3 }
 0x5a7   : > { %2582 = vmatmul.msk.f32.vlgmr.msrb.gmra.mxu3 %vm2045_vm3, %v1927_v62  ;;  %v1943_v63 = vmul.f32 %v1930_v35, %v1927_v62  ;;  %v1966_v0 = vmul.f32 %v1927_v62, %v1927_v62  ;;  %v1978_v1 = vmul.f32 %v1927_v62, %v1907_v53 }
 0x5a9   : > { %v1944_v28 = vsel %vm1932_vm14, %v1943_v63, 0.0  ;;  %v1967_v47 = vmul.f32 %v1966_v0, %v1930_v35  ;;  %v1979_v57 = vmul.f32 %v1978_v1, %v1930_v35 }
 0x5aa   : > { %1945 = vadd.xlane.f32.xlu2 %v1944_v28 }
 0x5ab   : > { %v1968_v45 = vsel %vm1932_vm14, %v1967_v47, 0.0  ;;  %v1980_v3 = vsel %vm1932_vm14, %v1979_v57, 0.0 }
 0x5ac   : > { %1969 = vadd.xlane.f32.xlu1 %v1968_v45  ;;  %v2145_v45 = vld [vmem:[#allocation15] sm:$0x3] }
 0x5b2   : > { %1981 = vadd.xlane.f32.xlu2 %v1980_v3 }
 0x5f5   : > { %v1935_v4 = vpop.xlane.xlu1 %1934 }
 0x5f6   : > { %v1936_v5 = vrot.slane %v1935_v4, 4 }
 0x5f7   : > { %v1958_v12 = vpop.xlane.xlu0 %1957 }
 0x5f8   : > { %v1937_v6 = vadd.f32 %v1936_v5, %v1935_v4  ;;  %v1959_v14 = vrot.slane %v1958_v12, 4 }
 0x5fa   : > { %v1938_v26 = vrot.slane %v1937_v6, 2  ;;  %v1960_v15 = vadd.f32 %v1959_v14, %v1958_v12 }
 0x5fc   : > { %v1939_v7 = vadd.f32 %v1938_v26, %v1937_v6  ;;  %v2070_v9 = vpop.f32.mrf.mxu1  ;;  %v1961_v49 = vrot.slane %v1960_v15, 2  ;;  %v815_v26 = vlaneseq }
 0x5fd   : > { %2583 = vmatpush.msk.msra.mxu1 %vm2049_vm15, %v2070_v9  ;;  %v1631_v9 = vstv %s4028_s20 }
 0x5fe   : > { %v1940_v11 = vrot.slane %v1939_v7, 1  ;;  %2584 = vmatmul.msk.f32.vlgmr.msra.gmra.mxu1 %vm2045_vm3, %v2043_v10  ;;  %v1962_v17 = vadd.f32 %v1961_v49, %v1960_v15 }
 0x600   : > { %v1941_v56 = vadd.f32 %v1940_v11, %v1939_v7  ;;  %v1963_v21 = vrot.slane %v1962_v17, 1  ;;  %v4067_v7 = vand.u32 127, %v815_v26 }
 0x602   : > { %2613 = vpush %v1941_v56  ;;  %v1964_v31 = vadd.f32 %v1963_v21, %v1962_v17  ;;  %vm1619_vm12 = vcmp.eq.s32.totalorder %v4067_v7, 1  ;;  %vm1248_vm11 = vcmp.eq.s32.totalorder %v4067_v7, 0  ;;  %vm1835_vm0 = vcmp.eq.s32.totalorder %v4067_v7, 2 }
 0x603   : > { %v1632_v56 = vsel %vm1619_vm12, %v1631_v9, 0.0  ;;  %vm2039_vm13 = vcmp.eq.s32.totalorder %v4067_v7, 3 }
 0x61d   : > { %v1946_v55 = vpop.xlane.xlu2 %1945 }
 0x61e   : > { %v1947_v8 = vrot.slane %v1946_v55, 4 }
 0x61f   : > { %v1970_v34 = vpop.xlane.xlu1 %1969 }
 0x620   : > { %v1948_v19 = vadd.f32 %v1947_v8, %v1946_v55  ;;  %v1971_v39 = vrot.slane %v1970_v34, 4 }
 0x622   : > { %v1949_v20 = vrot.slane %v1948_v19, 2  ;;  %v1972_v16 = vadd.f32 %v1971_v39, %v1970_v34 }
 0x624   : > { %v1973_v22 = vrot.slane %v1972_v16, 2  ;;  %v1950_v2 = vadd.f32 %v1949_v20, %v1948_v19 }
 0x625   : > { %v1982_v23 = vpop.xlane.xlu2 %1981 }
 0x626   : > { %v1983_v24 = vrot.slane %v1982_v23, 4  ;;  %v1951_v29 = vrot.slane %v1950_v2, 1  ;;  %v1974_v30 = vadd.f32 %v1973_v22, %v1972_v16 }
 0x628   : > { %v1984_v32 = vadd.f32 %v1983_v24, %v1982_v23  ;;  %v1952_v33 = vadd.f32 %v1951_v29, %v1950_v2  ;;  %v1975_v25 = vrot.slane %v1974_v30, 1 }
 0x62a   : > { %v1985_v36 = vrot.slane %v1984_v32, 2  ;;  %2615 = vpush %v1952_v33  ;;  %v2093_v37 = vpop.f32.mrf.mxu3  ;;  %v1976_v38 = vadd.f32 %v1975_v25, %v1974_v30 }
 0x62b   : > { %2585 = vmatpush.msk.msra.mxu2 %vm2049_vm15, %v2093_v37  ;;  %2617 = vpush %v1964_v31 }
 0x62c   : > { %2619 = vpush %v1976_v38  ;;  %2586 = vmatmul.msk.f32.vlgmr.msra.gmra.mxu2 %vm2045_vm3, %v2043_v10  ;;  %v1986_v40 = vadd.f32 %v1985_v36, %v1984_v32  ;;  %v1265_v10 = vstv %s4026_s0 }
 0x62d   : > { %v1266_v12 = vsel %vm1248_vm11, %v1265_v10, 0.0 }
 0x62e   : > { %v1987_v41 = vrot.slane %v1986_v40, 1  ;;  %v1633_v15 = vadd.f32 %v1632_v56, %v1266_v12 }
 0x630   : > { %v1988_v42 = vadd.f32 %v1987_v41, %v1986_v40 }
 0x632   : > { %2621 = vpush %v1988_v42 }
 0x633   : > { %s2614_s29 = spop %2613 }
 0x634   : > { %s1990_s24 = smul.f32 %s2614_s29, %s2614_s29 }
 0x65b   : > { %s2616_s11 = spop %2615 }
 0x65c   : > { %s1991_s10 = smul.f32 %s2616_s11, %s2616_s11  ;;  %s2618_s3 = spop %2617 }
 0x65d   : > { %s4058_s6 = smul.f32 %s2616_s11, %s2614_s29  ;;  %s1993_s18 = ssub.f32 %s2618_s3, %s1990_s24 }
 0x65e   : > { %s2020_s21 = sadd.f32 %s1991_s10, %s1990_s24  ;;  %s2620_s4 = spop %2619 }
 0x65f   : > { %s1994_s23 = ssub.f32 %s2620_s4, %s1991_s10  ;;  %s1834_s11 = smul.f32 %s4056_s17, %s1815_s27 }
 0x660   : > { %s2021_s2 = sadd.f32 0.0001, %s2020_s21  ;;  %s2017_s10 = smul.f32 2.0, %s4058_s6 }
 0x661   : > { %s1998_s16 = sadd.f32 %s1994_s23, %s1993_s18  ;;  %v1836_v11 = vstv %s1834_s11 }
 0x662   : > { %v2022_v43 = vstv %s2021_s2  ;;  %s2018_s21 = sadd.f32 0.0001, %s2017_s10  ;;  %v1837_v14 = vsel %vm1835_vm0, %v1836_v11, 0.0 }
 0x663   : > { %2838 = vrcp.f32 %v2022_v43  ;;  %s1999_s9 = sadd.f32 0.0009, %s1998_s16  ;;  %v2034_v59 = vand.u32 2147483648, %v2022_v43  ;;  %vm2028_vm6 = vweird.f32 %v2022_v43  ;;  %v2032_v61 = vand.u32 2147483647, %v2022_v43  ;;  %s2622_s1 = spop %2621 }
 0x664   : > { %s1995_s29 = ssub.f32 %s2622_s1, %s4058_s6  ;;  %v1838_v55 = vadd.f32 %v1837_v14, %v1633_v15 }
 0x665   : > { %v2000_v18 = vstv %s1999_s9  ;;  %v2035_v0 = vor.u32 1.1754944e-38, %v2034_v59  ;;  %vm2033_vm9 = vcmp.eq.f32.partialorder %v2032_v61, 8.507059e+37 }
 0x666   : > { %2840 = vrcp.f32 %v2000_v18  ;;  %v2012_v53 = vand.u32 2147483648, %v2000_v18  ;;  %v2010_v54 = vand.u32 2147483647, %v2000_v18  ;;  %vm2006_vm1 = vweird.f32 %v2000_v18  ;;  %s1996_s24 = smul.f32 2.0, %s1995_s29 }
 0x668   : > { %v2013_v60 = vor.u32 1.1754944e-38, %v2012_v53  ;;  %vm2011_vm8 = vcmp.eq.f32.partialorder %v2010_v54, 8.507059e+37  ;;  %s1997_s3 = sadd.f32 0.0009, %s1996_s24 }
 0x669   : > { %v2839_v44 = vpop.eup %2838 }
 0x66a   : > { %v2024_v46 = vmul.f32 %v2839_v44, %v2022_v43  ;;  %vm2029_vm4 = vweird.f32 %v2839_v44 }
 0x66b   : > { %vm2030_vm2 = vmor %vm2028_vm6, %vm2029_vm4 }
 0x66c   : > { %v2025_v48 = vsub.f32 1.0, %v2024_v46  ;;  %v2841_v50 = vpop.eup %2840 }
 0x66d   : > { %v2002_v51 = vmul.f32 %v2841_v50, %v2000_v18  ;;  %vm2007_vm5 = vweird.f32 %v2841_v50 }
 0x66e   : > { %v2026_v13 = vmul.f32 %v2839_v44, %v2025_v48  ;;  %vm2008_vm7 = vmor %vm2006_vm1, %vm2007_vm5 }
 0x66f   : > { %v2003_v52 = vsub.f32 1.0, %v2002_v51 }
 0x670   : > { %v2027_v35 = vadd.f32 %v2839_v44, %v2026_v13 }
 0x671   : > { %v2004_v58 = vmul.f32 %v2841_v50, %v2003_v52 }
 0x672   : > { %v2031_v62 = vsel %vm2030_vm2, %v2839_v44, %v2027_v35 }
 0x673   : > { %v2005_v27 = vadd.f32 %v2841_v50, %v2004_v58  ;;  %v2036_v47 = vsel %vm2033_vm9, %v2035_v0, %v2031_v62  ;;  %vm2262_vm9 = vcmask 40960  }
 0x675   : > { %v2009_v63 = vsel %vm2008_vm7, %v2841_v50, %v2005_v27  ;;  %vm2254_vm7 = vcmp.eq.s32.totalorder %v4067_v7, 4 }
 0x676   : > { %v2014_v28 = vsel %vm2011_vm8, %v2013_v60, %v2009_v63  ;;  %vm2258_vm8 = vcmp.eq.s32.totalorder %v4067_v7, 5 }
 0x677   : > { %2623 = vpush %v2014_v28 }
 0x678   : > { %2625 = vpush %v2036_v47 }
 0x67b   : > { %v2119_v1 = vpop.f32.mrf.mxu1 }
 0x67c   : > { %v2146_v57 = vmul.f32 %v2145_v45, %v2119_v1  ;;  %v2169_v3 = vmul.f32 %v2119_v1, %v2119_v1 }
 0x67e   : > { %v2148_v4 = vsel %vm2147_vm10, %v2146_v57, 0.0  ;;  %v2170_v5 = vmul.f32 %v2169_v3, %v2145_v45 }
 0x67f   : > { %2149 = vadd.xlane.f32.xlu0 %v2148_v4 }
 0x680   : > { %v2171_v6 = vsel %vm2147_vm10, %v2170_v5, 0.0 }
 0x681   : > { %2172 = vadd.xlane.f32.xlu2 %v2171_v6 }
 0x6a8   : > { %s2624_s18 = spop %2623 }
 0x6a9   : > { %s2016_s4 = smul.f32 %s2624_s18, %s1997_s3  ;;  %s2626_s7 = spop %2625 }
 0x6ab   : > { %s2019_s23 = smul.f32 %s2018_s21, %s2016_s4 }
 0x6ad   : > { %s2038_s8 = smul.f32 %s2626_s7, %s2019_s23 }
 0x6af   : > { %v2142_v49 = vpop.f32.mrf.mxu2  ;;  %v2040_v8 = vstv %s2038_s8 }
 0x6b0   : > { %v2158_v34 = vmul.f32 %v2145_v45, %v2142_v49  ;;  %v2181_v17 = vmul.f32 %v2142_v49, %v2142_v49  ;;  %v2041_v19 = vsel %vm2039_vm13, %v2040_v8, 0.0  ;;  %v2193_v20 = vmul.f32 %v2142_v49, %v2119_v1 }
 0x6b1   : > { %v4076_v39 = vadd.f32 %v2041_v19, %v1838_v55 }
 0x6b2   : > { %v2159_v16 = vsel %vm2147_vm10, %v2158_v34, 0.0  ;;  %v2182_v21 = vmul.f32 %v2181_v17, %v2145_v45  ;;  %v2194_v2 = vmul.f32 %v2193_v20, %v2145_v45 }
 0x6b3   : > { %2160 = vadd.xlane.f32.xlu1 %v2159_v16 }
 0x6b4   : > { %v2183_v22 = vsel %vm2147_vm10, %v2182_v21, 0.0  ;;  %v2195_v23 = vsel %vm2147_vm10, %v2194_v2, 0.0 }
 0x6b5   : > { %2184 = vadd.xlane.f32.xlu0 %v2183_v22 }
 0x6bb   : > { %2196 = vadd.xlane.f32.xlu1 %v2195_v23 }
 0x6f2   : > { %v2150_v24 = vpop.xlane.xlu0 %2149 }
 0x6f3   : > { %v2151_v29 = vrot.slane %v2150_v24, 4 }
 0x6f4   : > { %v2173_v36 = vpop.xlane.xlu2 %2172 }
 0x6f5   : > { %v2152_v30 = vadd.f32 %v2151_v29, %v2150_v24  ;;  %v2174_v37 = vrot.slane %v2173_v36, 4 }
 0x6f7   : > { %v2153_v31 = vrot.slane %v2152_v30, 2  ;;  %v2175_v38 = vadd.f32 %v2174_v37, %v2173_v36 }
 0x6f9   : > { %v2154_v32 = vadd.f32 %v2153_v31, %v2152_v30  ;;  %v2176_v41 = vrot.slane %v2175_v38, 2 }
 0x6fb   : > { %v2155_v33 = vrot.slane %v2154_v32, 1  ;;  %v2177_v46 = vadd.f32 %v2176_v41, %v2175_v38 }
 0x6fd   : > { %v2156_v25 = vadd.f32 %v2155_v33, %v2154_v32  ;;  %v2178_v52 = vrot.slane %v2177_v46, 1 }
 0x6ff   : > { %2627 = vpush %v2156_v25  ;;  %v2179_v60 = vadd.f32 %v2178_v52, %v2177_v46 }
 0x726   : > { %v2161_v40 = vpop.xlane.xlu1 %2160 }
 0x727   : > { %v2162_v42 = vrot.slane %v2161_v40, 4 }
 0x728   : > { %v2185_v43 = vpop.xlane.xlu0 %2184 }
 0x729   : > { %v2163_v18 = vadd.f32 %v2162_v42, %v2161_v40  ;;  %v2186_v44 = vrot.slane %v2185_v43, 4 }
 0x72b   : > { %v2164_v48 = vrot.slane %v2163_v18, 2  ;;  %v2187_v50 = vadd.f32 %v2186_v44, %v2185_v43 }
 0x72d   : > { %v2188_v51 = vrot.slane %v2187_v50, 2  ;;  %v2165_v13 = vadd.f32 %v2164_v48, %v2163_v18 }
 0x72e   : > { %v2197_v53 = vpop.xlane.xlu1 %2196 }
 0x72f   : > { %v2189_v35 = vadd.f32 %v2188_v51, %v2187_v50  ;;  %v2166_v58 = vrot.slane %v2165_v13, 1  ;;  %v2198_v54 = vrot.slane %v2197_v53, 4 }
 0x730   : > { %s2628_s0 = spop %2627 }
 0x731   : > { %v2167_v59 = vadd.f32 %v2166_v58, %v2165_v13  ;;  %v2190_v61 = vrot.slane %v2189_v35, 1  ;;  %v2199_v27 = vadd.f32 %v2198_v54, %v2197_v53  ;;  %s2205_s20 = smul.f32 %s2628_s0, %s2628_s0 }
 0x733   : > { %2629 = vpush %v2167_v59  ;;  %v2191_v62 = vadd.f32 %v2190_v61, %v2189_v35  ;;  %v2200_v63 = vrot.slane %v2199_v27, 2 }
 0x734   : > { %2631 = vpush %v2179_v60 }
 0x735   : > { %2633 = vpush %v2191_v62  ;;  %v2201_v0 = vadd.f32 %v2200_v63, %v2199_v27 }
 0x737   : > { %v2202_v28 = vrot.slane %v2201_v0, 1 }
 0x739   : > { %v2203_v47 = vadd.f32 %v2202_v28, %v2201_v0 }
 0x73b   : > { %2635 = vpush %v2203_v47 }
 0x764   : > { %s2630_s27 = spop %2629 }
 0x765   : > { %s2206_s17 = smul.f32 %s2630_s27, %s2630_s27  ;;  %s2632_s6 = spop %2631 }
 0x766   : > { %s4081_s2 = smul.f32 %s2630_s27, %s2628_s0  ;;  %s2208_s16 = ssub.f32 %s2632_s6, %s2205_s20 }
 0x767   : > { %s2235_s9 = sadd.f32 %s2206_s17, %s2205_s20  ;;  %s2634_s1 = spop %2633 }
 0x768   : > { %s2209_s29 = ssub.f32 %s2634_s1, %s2206_s17  ;;  %s2232_s4 = smul.f32 2.0, %s4081_s2 }
 0x769   : > { %s2236_s24 = sadd.f32 0.0001, %s2235_s9 }
 0x76a   : > { %s2213_s11 = sadd.f32 %s2209_s29, %s2208_s16 }
 0x76b   : > { %v2237_v1 = vstv %s2236_s24  ;;  %s2233_s8 = sadd.f32 0.0001, %s2232_s4 }
 0x76c   : > { %2842 = vrcp.f32 %v2237_v1  ;;  %s2214_s10 = sadd.f32 0.0009, %s2213_s11  ;;  %v2249_v14 = vand.u32 2147483648, %v2237_v1  ;;  %vm2243_vm3 = vweird.f32 %v2237_v1  ;;  %v2247_v15 = vand.u32 2147483647, %v2237_v1  ;;  %s2636_s3 = spop %2635 }
 0x76d   : > { %s2210_s18 = ssub.f32 %s2636_s3, %s4081_s2 }
 0x76e   : > { %v2215_v45 = vstv %s2214_s10  ;;  %v2250_v17 = vor.u32 1.1754944e-38, %v2249_v14  ;;  %vm2248_vm2 = vcmp.eq.f32.partialorder %v2247_v15, 8.507059e+37  ;;  %s4182_s16 = sld [smem:[#allocation48_spill]] }
 0x76f   : > { %2844 = vrcp.f32 %v2215_v45  ;;  %v2227_v10 = vand.u32 2147483648, %v2215_v45  ;;  %v2225_v12 = vand.u32 2147483647, %v2215_v45  ;;  %vm2221_vm4 = vweird.f32 %v2215_v45  ;;  %s2211_s21 = smul.f32 2.0, %s2210_s18 }
 0x771   : > { %v2228_v55 = vor.u32 1.1754944e-38, %v2227_v10  ;;  %vm2226_vm1 = vcmp.eq.f32.partialorder %v2225_v12, 8.507059e+37  ;;  %s2212_s23 = sadd.f32 0.0009, %s2211_s21 }
 0x772   : > { %v2843_v57 = vpop.eup %2842 }
 0x773   : > { %v2239_v3 = vmul.f32 %v2843_v57, %v2237_v1  ;;  %vm2244_vm14 = vweird.f32 %v2843_v57 }
 0x774   : > { %vm2245_vm5 = vmor %vm2243_vm3, %vm2244_vm14  ;;  %s806_s9 = scalar_lea.vmem %s4182_s16, %s4188_s30 }
 0x775   : > { %v2240_v4 = vsub.f32 1.0, %v2239_v3  ;;  %v2845_v5 = vpop.eup %2844 }
 0x776   : > { %v2217_v6 = vmul.f32 %v2845_v5, %v2215_v45  ;;  %vm2222_vm15 = vweird.f32 %v2845_v5 }
 0x777   : > { %v2241_v26 = vmul.f32 %v2843_v57, %v2240_v4  ;;  %vm2223_vm6 = vmor %vm2221_vm4, %vm2222_vm15 }
 0x778   : > { %v2218_v9 = vsub.f32 1.0, %v2217_v6 }
 0x779   : > { %v2242_v11 = vadd.f32 %v2843_v57, %v2241_v26 }
 0x77a   : > { %v2219_v56 = vmul.f32 %v2845_v5, %v2218_v9 }
 0x77b   : > { %v2246_v8 = vsel %vm2245_vm5, %v2843_v57, %v2242_v11 }
 0x77c   : > { %v2220_v49 = vadd.f32 %v2845_v5, %v2219_v56  ;;  %v2251_v20 = vsel %vm2248_vm2, %v2250_v17, %v2246_v8 }
 0x77e   : > { %v2224_v34 = vsel %vm2223_vm6, %v2845_v5, %v2220_v49 }
 0x77f   : > { %v2229_v19 = vsel %vm2226_vm1, %v2228_v55, %v2224_v34 }
 0x780   : > { %2637 = vpush %v2229_v19 }
 0x781   : > { %2639 = vpush %v2251_v20 }
 0x7b1   : > { %s2638_s7 = spop %2637 }
 0x7b2   : > { %s2231_s0 = smul.f32 %s2638_s7, %s2212_s23  ;;  %s2640_s27 = spop %2639 }
 0x7b4   : > { %s2234_s20 = smul.f32 %s2233_s8, %s2231_s0  ;;  %v2259_v16 = vstv %s2231_s0 }
 0x7b5   : > { %v2260_v23 = vsel %vm2258_vm8, %v2259_v16, 0.0 }
 0x7b6   : > { %s2253_s17 = smul.f32 %s2640_s27, %s2234_s20 }
 0x7b8   : > { %v2255_v21 = vstv %s2253_s17 }
 0x7b9   : > { %v2256_v22 = vsel %vm2254_vm7, %v2255_v21, 0.0 }
 0x7ba   : > { %v2257_v2 = vadd.f32 %v2256_v22, %v4076_v39 }
 0x7bc   : > { %v2261_v24 = vadd.f32 %v2260_v23, %v2257_v2 }
 0x7be   : > { %2263 = vst.msk [vmem:[%s806_s9] sm:$0x1] %vm2262_vm9, %v2261_v24 }
 0x7bf PF: > { %p36_p3 = scmp.ge.s32.totalorder %s3588_s19, 8   ;;  %s4183_s24 = smov %s3354_s25 }
 0x7c0   : > { %s4184_s25 = smov %s3358_s26  ;;  %s4185_s26 = smov %s3599_s5 }
 0x7c1   : > { %s4186_s27 = smov %s3588_s19  ;;  %38 = sbr.rel (!%p36_p3) target bundleno = 27 (0x1b), region = 193 }
 0x7c6   :  { %2281 = vsyncpa [#allocation3], 1 }
 0x7c7   :  { %2283 = vsyncpa [#allocation3 + $0x1], 1 }
 0x7c8   :  { %2284 = vsyncpa [#allocation5], 1 }
 0x7c9   :  { %2286 = vsyncpa [#allocation5 + $0x1], 1 }
 0x7ca   :  { %2287 = vsyncpa [#allocation8], 1 }
 0x7cb   :  { %2288 = vsyncpa [#allocation11], 1 }
 0x7cc   :  { %2289 = vsyncpa [#allocation14], 1 }
 0x7cd   :  { %2290 = vsyncpa [#allocation17], 1 }
 0x7ce   :  { %2291 = vsyncpa [#allocation20], 1 }
 0x7cf   :  { %2292 = vsyncpa [#allocation23], 1 }

</bundles_post_ra>
